<compile_context>
chip_gen: v7x
topology: tpu7x:2x2x1
jax: 0.10.0
libtpu: 0.0.40
codegen_flags: <defaults>
</compile_context>

<pallas_src>
import functools

import jax
import jax.numpy as jnp
from jax.experimental import pallas as pl
from jax.experimental.pallas import tpu as pltpu


# ---------------------------------------------------------------------------
# Fused ensemble kernel: modelA -> {modelB, modelC} on sr_img, modelB on hr.
# ---------------------------------------------------------------------------
def _ensemble_kernel(lr_ref, hr_ref, wa_ref, ba_ref, wbc_ref, bbc_ref,
                     sr_ref, srd_ref, hrd_ref, det_ref,
                     pad_ref, col_ref, *, H, W, slope, lpad):
    HW = H * W
    cin = lr_ref.shape[1]
    cpad = pad_ref.shape[1]          # channels padded to a sublane multiple
    c_disc = srd_ref.shape[1]

    # Column-validity masks (row validity is handled by the zero halo).
    xx = jax.lax.broadcasted_iota(jnp.int32, (1, HW), 1) % W
    m_left = xx >= 1                 # tap dx == 0 reads column x-1
    m_right = xx <= W - 2            # tap dx == 2 reads column x+1

    # Zero only the two lane-aligned halo strips and the padded channel rows;
    # the used interior window is fully overwritten before every conv pass.
    pad_ref[:, :, :lpad] = jnp.zeros((2, cpad, lpad), jnp.float32)
    pad_ref[:, :, lpad + HW:] = jnp.zeros((2, cpad, lpad), jnp.float32)
    pad_ref[:, cin:, lpad:lpad + HW] = jnp.zeros((2, cpad - cin, HW),
                                                 jnp.float32)

    def build_im2col(buf):
        # Gather the 9 shifted+masked tap views into col_ref[buf]:
        # (9*cpad, HW), row order (dy*3 + dx)*cpad + ci == w2d column order.
        # All stores are 8-row-aligned (cpad % 8 == 0).
        for dy in range(3):
            for dx in range(3):
                off = (dy - 1) * W + (dx - 1)
                src = pad_ref[buf, :, lpad + off:lpad + off + HW]   # (cpad,HW)
                if dx == 0:
                    src = jnp.where(m_left, src, 0.0)
                elif dx == 2:
                    src = jnp.where(m_right, src, 0.0)
                tap = dy * 3 + dx
                col_ref[buf, tap * cpad:(tap + 1) * cpad, :] = src

    def conv_lrelu(buf, w2d, shift):
        # One MXU matmul per pass: (cout, 9*cpad) x (9*cpad, HW) -> (cout,HW).
        y = jnp.dot(w2d, col_ref[buf], preferred_element_type=jnp.float32)
        y = y + shift                           # bias (+ folded BN shift)
        return jnp.where(y >= 0, y, slope * y)  # LeakyReLU

    wbc = wbc_ref[...]   # hoisted: identical weights for the sr and hr passes
    bbc = bbc_ref[...]

    # Pass 1: modelA(low_res) -> sr_img (stays in VMEM/vregs for pass 2).
    pad_ref[0, :cin, lpad:lpad + HW] = lr_ref[0]
    build_im2col(0)
    sr = conv_lrelu(0, wa_ref[...], ba_ref[...])
    sr_ref[0] = sr

    # modelB(high_res): data-independent of the A->B/C(sr) chain, so it gets
    # its own halo/im2col buffers (index 1) and can interleave with passes 1-2.
    pad_ref[1, :cin, lpad:lpad + HW] = hr_ref[0]
    build_im2col(1)
    hrd_ref[0] = conv_lrelu(1, wbc[:c_disc], bbc[:c_disc])

    # Pass 2: modelB(sr_img) + modelC(sr_img) fused via concatenated weights.
    pad_ref[0, :cin, lpad:lpad + HW] = sr
    build_im2col(0)
    bc = conv_lrelu(0, wbc, bbc)
    srd_ref[0] = bc[:c_disc]
    det_ref[0] = bc[c_disc:]


# ---------------------------------------------------------------------------
# Wrapper: free NCHW -> (B, C, H*W) reshapes, single pallas_call.
# ---------------------------------------------------------------------------
def model_ensemble_forward(low_res, high_res, params):
    B, cin, H, W = low_res.shape
    HW = H * W
    pA, pB, pC = params["A"], params["B"], params["C"]
    cA, cB, cC = (p["w2d"].shape[0] for p in (pA, pB, pC))
    assert cA == cin, "modelA must be RGB->RGB so modelB/modelC can consume sr_img"

    cpad = ((cin + 7) // 8) * 8          # channel padding used by the kernel
    assert pA["w2d"].shape[1] == 9 * cpad

    # Fuse B and C weights so modelB(sr)+modelC(sr) is one MXU pass.
    wBC = jnp.concatenate([pB["w2d"], pC["w2d"]], axis=0)       # (cB+cC, 9*cpad)
    bBC = jnp.concatenate([pB["shift"], pC["shift"]], axis=0)   # (cB+cC, 1)

    lr = low_res.reshape(B, cin, HW)     # contiguous reshape, no transpose
    hr = high_res.reshape(B, cin, HW)

    lpad = (W + 1 + 127) // 128 * 128    # lane-aligned interior offset
    kernel = functools.partial(_ensemble_kernel, H=H, W=W, slope=0.01, lpad=lpad)

    per_b = lambda c: pl.BlockSpec((1, c, HW), lambda b: (b, 0, 0))
    shared = lambda r, c: pl.BlockSpec((r, c), lambda b: (0, 0))

    sr, srd, hrd, det = pl.pallas_call(
        kernel,
        out_shape=(
            jax.ShapeDtypeStruct((B, cA, HW), jnp.float32),
            jax.ShapeDtypeStruct((B, cB, HW), jnp.float32),
            jax.ShapeDtypeStruct((B, cB, HW), jnp.float32),
            jax.ShapeDtypeStruct((B, cC, HW), jnp.float32),
        ),
        grid=(B,),
        in_specs=[
            per_b(cin), per_b(cin),
            shared(cA, 9 * cpad), shared(cA, 1),
            shared(cB + cC, 9 * cpad), shared(cB + cC, 1),
        ],
        out_specs=(per_b(cA), per_b(cB), per_b(cB), per_b(cC)),
        scratch_shapes=[
            pltpu.VMEM((2, cpad, 2 * lpad + HW), jnp.float32),   # haloed input
            pltpu.VMEM((2, 9 * cpad, HW), jnp.float32),          # im2col
        ],
        compiler_params=pltpu.CompilerParams(dimension_semantics=("parallel",)),
    )(lr, hr, pA["w2d"], pA["shift"], wBC, bBC)

    return (sr.reshape(B, cA, H, W), srd.reshape(B, cB, H, W),
            hrd.reshape(B, cB, H, W), det.reshape(B, cC, H, W))


# ---------------------------------------------------------------------------
# Deterministic in-script parameters (Conv2d OIHW + folded BN, PyTorch-style)
# ---------------------------------------------------------------------------
def _make_block_params(key, cin, cout, *, with_bn, eps=1e-5):
    kw, kb, kg, kbt, km, kv = jax.random.split(key, 6)
    w = jax.random.normal(kw, (cout, cin, 3, 3), jnp.float32) * 0.1   # OIHW
    bias = jax.random.normal(kb, (cout,), jnp.float32) * 0.05
    if with_bn:
        gamma = 1.0 + 0.1 * jax.random.normal(kg, (cout,), jnp.float32)
        beta = 0.1 * jax.random.normal(kbt, (cout,), jnp.float32)
        mean = 0.1 * jax.random.normal(km, (cout,), jnp.float32)
        var = 1.0 + 0.1 * jax.random.uniform(kv, (cout,), jnp.float32)
        scale = gamma / jnp.sqrt(var + eps)
        shift = beta + (bias - mean) * scale
    else:
        scale = jnp.ones((cout,), jnp.float32)
        shift = bias
    # Kernel weight layout: (cout, 9*cpad), column = (dy*3 + dx)*cpad + ci,
    # with channels zero-padded to a sublane multiple and the folded BN scale
    # baked into the weights (one-time host-side transform).
    cpad = ((cin + 7) // 8) * 8
    w_pad = jnp.pad(w, ((0, 0), (0, cpad - cin), (0, 0), (0, 0)))
    w2d = jnp.transpose(w_pad, (0, 2, 3, 1)).reshape(cout, 9 * cpad)
    w2d = w2d * scale.reshape(cout, 1)
    return {"w2d": w2d, "w_oihw": w,
            "scale": scale.reshape(cout, 1), "shift": shift.reshape(cout, 1)}


# ---------------------------------------------------------------------------
# Pure-JAX reference (lax.conv) for a runtime correctness check
# ---------------------------------------------------------------------------
def _ref_block(x, p, slope=0.01):
    y = jax.lax.conv_general_dilated(
        x, p["w_oihw"], window_strides=(1, 1), padding="SAME",
        dimension_numbers=("NCHW", "OIHW", "NCHW"))
    y = y * p["scale"].reshape(1, -1, 1, 1) + p["shift"].reshape(1, -1, 1, 1)
    return jnp.where(y >= 0, y, slope * y)


def _ref_forward(low_res, high_res, params):
    sr = _ref_block(low_res, params["A"])
    return (sr, _ref_block(sr, params["B"]),
            _ref_block(high_res, params["B"]), _ref_block(sr, params["C"]))


if __name__ == "__main__":
    B, C, H, W = 2, 3, 16, 16
    key = jax.random.PRNGKey(0)
    k_lr, k_hr, kA, kB, kC = jax.random.split(key, 5)

    low_res = jax.random.normal(k_lr, (B, C, H, W), jnp.float32)
    high_res = jax.random.normal(k_hr, (B, C, H, W), jnp.float32)

    params = {
        "A": _make_block_params(kA, C, 3, with_bn=True),   # SR generator
        "B": _make_block_params(kB, C, 8, with_bn=True),   # discriminator
        "C": _make_block_params(kC, C, 4, with_bn=False),  # detector
    }

    outs = jax.block_until_ready(
        jax.jit(model_ensemble_forward)(low_res, high_res, params))
    sr_img, sr_disc, hr_disc, detection = outs

    assert sr_img.shape == (B, 3, H, W)
    assert sr_disc.shape == (B, 8, H, W)
    assert hr_disc.shape == (B, 8, H, W)
    assert detection.shape == (B, 4, H, W)

    refs = _ref_forward(low_res, high_res, params)
    for got, ref in zip(outs, refs):
        err = float(jnp.max(jnp.abs(got - ref)))
        assert jnp.allclose(got, ref, rtol=1e-4, atol=1e-4), err

    print("KERNEL_OK")
</pallas_src>

<mosaic_0001>
module attributes {stable_mosaic.version = 11 : i64} {
  func.func @_ensemble_kernel(%arg0: i32, %arg1: memref<1x3x256xf32, #tpu.memory_space<vmem>>, %arg2: memref<1x3x256xf32, #tpu.memory_space<vmem>>, %arg3: memref<3x72xf32, #tpu.memory_space<vmem>>, %arg4: memref<3x1xf32, #tpu.memory_space<vmem>>, %arg5: memref<12x72xf32, #tpu.memory_space<vmem>>, %arg6: memref<12x1xf32, #tpu.memory_space<vmem>>, %arg7: memref<1x3x256xf32, #tpu.memory_space<vmem>>, %arg8: memref<1x8x256xf32, #tpu.memory_space<vmem>>, %arg9: memref<1x8x256xf32, #tpu.memory_space<vmem>>, %arg10: memref<1x4x256xf32, #tpu.memory_space<vmem>>, %arg11: memref<2x8x512xf32, #tpu.memory_space<vmem>>, %arg12: memref<2x72x256xf32, #tpu.memory_space<vmem>>) attributes {dimension_semantics = [#tpu.dimension_semantics<parallel>], iteration_bounds = array<i64: 2>, scalar_prefetch = 0 : i64, scratch_operands = 2 : i64, tpu.core_type = #tpu.core_type<tc>, window_params = [{transform_indices = @transform_0, window_bounds = array<i64: 1, 3, 256>}, {transform_indices = @transform_1, window_bounds = array<i64: 1, 3, 256>}, {pipeline_mode = #tpu.pipeline_mode<synchronous>, transform_indices = @transform_2, window_bounds = array<i64: 3, 72>}, {pipeline_mode = #tpu.pipeline_mode<synchronous>, transform_indices = @transform_3, window_bounds = array<i64: 3, 1>}, {pipeline_mode = #tpu.pipeline_mode<synchronous>, transform_indices = @transform_4, window_bounds = array<i64: 12, 72>}, {pipeline_mode = #tpu.pipeline_mode<synchronous>, transform_indices = @transform_5, window_bounds = array<i64: 12, 1>}, {transform_indices = @transform_6, window_bounds = array<i64: 1, 3, 256>}, {transform_indices = @transform_7, window_bounds = array<i64: 1, 8, 256>}, {transform_indices = @transform_8, window_bounds = array<i64: 1, 8, 256>}, {transform_indices = @transform_9, window_bounds = array<i64: 1, 4, 256>}]} {
    %0 = tpu.iota {dimensions = array<i32: 1>} : vector<1x256xi32>
    %c16_i32 = arith.constant 16 : i32
    %c0_i32 = arith.constant 0 : i32
    %1 = arith.cmpi eq, %c16_i32, %c0_i32 : i32
    %c1_i32 = arith.constant 1 : i32
    %2 = arith.select %1, %c1_i32, %c16_i32 : i32
    %3 = vector.broadcast %2 : i32 to vector<1x256xi32>
    %4 = arith.remsi %0, %3 : vector<1x256xi32>
    %c0_i32_0 = arith.constant 0 : i32
    %5 = vector.broadcast %c0_i32_0 : i32 to vector<1x256xi32>
    %6 = arith.cmpi ne, %4, %5 : vector<1x256xi32>
    %c0_i32_1 = arith.constant 0 : i32
    %7 = vector.broadcast %c0_i32_1 : i32 to vector<1x256xi32>
    %8 = arith.cmpi slt, %4, %7 : vector<1x256xi32>
    %c0_i32_2 = arith.constant 0 : i32
    %9 = arith.cmpi slt, %2, %c0_i32_2 : i32
    %10 = vector.broadcast %9 : i1 to vector<1x256xi1>
    %11 = vector.broadcast %10 : vector<1x256xi1> to vector<1x256xi1>
    %12 = arith.xori %8, %11 : vector<1x256xi1>
    %13 = arith.andi %12, %6 : vector<1x256xi1>
    %14 = vector.broadcast %2 : i32 to vector<1x256xi32>
    %15 = arith.addi %4, %14 : vector<1x256xi32>
    %16 = arith.select %13, %15, %4 : vector<1x256xi1>, vector<1x256xi32>
    %c1_i32_3 = arith.constant 1 : i32
    %17 = vector.broadcast %c1_i32_3 : i32 to vector<1x256xi32>
    %18 = arith.cmpi sge, %16, %17 : vector<1x256xi32>
    %c14_i32 = arith.constant 14 : i32
    %19 = vector.broadcast %c14_i32 : i32 to vector<1x256xi32>
    %20 = arith.cmpi sle, %16, %19 : vector<1x256xi32>
    %cst = arith.constant 0.000000e+00 : f32
    %21 = vector.broadcast %cst : f32 to vector<2x8x128xf32>
    %c0 = arith.constant 0 : index
    %c0_4 = arith.constant 0 : index
    %c0_5 = arith.constant 0 : index
    %22 = vector.load %arg11[%c0, %c0_4, %c0_5] : memref<2x8x512xf32, #tpu.memory_space<vmem>>, vector<2x8x128xf32>
    tpu.vector_store %arg11[%c0, %c0_4, %c0_5], %21 {strides = array<i32>} : memref<2x8x512xf32, #tpu.memory_space<vmem>>, vector<2x8x128xf32>,
    %cst_6 = arith.constant 0.000000e+00 : f32
    %23 = vector.broadcast %cst_6 : f32 to vector<2x8x128xf32>
    %c0_7 = arith.constant 0 : index
    %c0_8 = arith.constant 0 : index
    %c384 = arith.constant 384 : index
    %24 = vector.load %arg11[%c0_7, %c0_8, %c384] : memref<2x8x512xf32, #tpu.memory_space<vmem>>, vector<2x8x128xf32>
    tpu.vector_store %arg11[%c0_7, %c0_8, %c384], %23 {strides = array<i32>} : memref<2x8x512xf32, #tpu.memory_space<vmem>>, vector<2x8x128xf32>,
    %cst_9 = arith.constant 0.000000e+00 : f32
    %25 = vector.broadcast %cst_9 : f32 to vector<2x5x256xf32>
    %c0_10 = arith.constant 0 : index
    %c3 = arith.constant 3 : index
    %c128 = arith.constant 128 : index
    %26 = vector.load %arg11[%c0_10, %c3, %c128] : memref<2x8x512xf32, #tpu.memory_space<vmem>>, vector<2x5x256xf32>
    tpu.vector_store %arg11[%c0_10, %c3, %c128], %25 {strides = array<i32>} : memref<2x8x512xf32, #tpu.memory_space<vmem>>, vector<2x5x256xf32>,
    %c0_11 = arith.constant 0 : index
    %c0_12 = arith.constant 0 : index
    %27 = vector.load %arg5[%c0_11, %c0_12] : memref<12x72xf32, #tpu.memory_space<vmem>>, vector<12x72xf32>
    %c0_13 = arith.constant 0 : index
    %c0_14 = arith.constant 0 : index
    %28 = vector.load %arg6[%c0_13, %c0_14] : memref<12x1xf32, #tpu.memory_space<vmem>>, vector<12x1xf32>
    %c0_15 = arith.constant 0 : index
    %c0_16 = arith.constant 0 : index
    %c0_17 = arith.constant 0 : index
    %29 = vector.load %arg1[%c0_15, %c0_16, %c0_17] : memref<1x3x256xf32, #tpu.memory_space<vmem>>, vector<1x3x256xf32>
    %30 = vector.shape_cast %29 : vector<1x3x256xf32> to vector<3x256xf32>
    %c0_18 = arith.constant 0 : index
    %c0_19 = arith.constant 0 : index
    %c128_20 = arith.constant 128 : index
    %31 = vector.load %arg11[%c0_18, %c0_19, %c128_20] : memref<2x8x512xf32, #tpu.memory_space<vmem>>, vector<1x3x256xf32>
    %32 = vector.shape_cast %31 : vector<1x3x256xf32> to vector<3x256xf32>
    %33 = vector.shape_cast %30 : vector<3x256xf32> to vector<1x3x256xf32>
    tpu.vector_store %arg11[%c0_18, %c0_19, %c128_20], %33 {strides = array<i32>} : memref<2x8x512xf32, #tpu.memory_space<vmem>>, vector<1x3x256xf32>,
    %c0_21 = arith.constant 0 : index
    %c0_22 = arith.constant 0 : index
    %c111 = arith.constant 111 : index
    %34 = vector.load %arg11[%c0_21, %c0_22, %c111] : memref<2x8x512xf32, #tpu.memory_space<vmem>>, vector<1x8x256xf32>
    %35 = vector.shape_cast %34 : vector<1x8x256xf32> to vector<8x256xf32>
    %cst_23 = arith.constant 0.000000e+00 : f32
    %36 = vector.shape_cast %18 : vector<1x256xi1> to vector<1x256xi1>
    %37 = vector.broadcast %36 : vector<1x256xi1> to vector<8x256xi1>
    %38 = vector.broadcast %cst_23 : f32 to vector<8x256xf32>
    %39 = arith.select %37, %35, %38 : vector<8x256xi1>, vector<8x256xf32>
    %c0_24 = arith.constant 0 : index
    %c0_25 = arith.constant 0 : index
    %c0_26 = arith.constant 0 : index
    %40 = vector.load %arg12[%c0_24, %c0_25, %c0_26] : memref<2x72x256xf32, #tpu.memory_space<vmem>>, vector<1x8x256xf32>
    %41 = vector.shape_cast %40 : vector<1x8x256xf32> to vector<8x256xf32>
    %42 = vector.shape_cast %39 : vector<8x256xf32> to vector<1x8x256xf32>
    tpu.vector_store %arg12[%c0_24, %c0_25, %c0_26], %42 {strides = array<i32>} : memref<2x72x256xf32, #tpu.memory_space<vmem>>, vector<1x8x256xf32>,
    %c0_27 = arith.constant 0 : index
    %c0_28 = arith.constant 0 : index
    %c112 = arith.constant 112 : index
    %43 = vector.load %arg11[%c0_27, %c0_28, %c112] : memref<2x8x512xf32, #tpu.memory_space<vmem>>, vector<1x8x256xf32>
    %44 = vector.shape_cast %43 : vector<1x8x256xf32> to vector<8x256xf32>
    %c0_29 = arith.constant 0 : index
    %c8 = arith.constant 8 : index
    %c0_30 = arith.constant 0 : index
    %45 = vector.load %arg12[%c0_29, %c8, %c0_30] : memref<2x72x256xf32, #tpu.memory_space<vmem>>, vector<1x8x256xf32>
    %46 = vector.shape_cast %45 : vector<1x8x256xf32> to vector<8x256xf32>
    %47 = vector.shape_cast %44 : vector<8x256xf32> to vector<1x8x256xf32>
    tpu.vector_store %arg12[%c0_29, %c8, %c0_30], %47 {strides = array<i32>} : memref<2x72x256xf32, #tpu.memory_space<vmem>>, vector<1x8x256xf32>,
    %c0_31 = arith.constant 0 : index
    %c0_32 = arith.constant 0 : index
    %c113 = arith.constant 113 : index
    %48 = vector.load %arg11[%c0_31, %c0_32, %c113] : memref<2x8x512xf32, #tpu.memory_space<vmem>>, vector<1x8x256xf32>
    %49 = vector.shape_cast %48 : vector<1x8x256xf32> to vector<8x256xf32>
    %cst_33 = arith.constant 0.000000e+00 : f32
    %50 = vector.shape_cast %20 : vector<1x256xi1> to vector<1x256xi1>
    %51 = vector.broadcast %50 : vector<1x256xi1> to vector<8x256xi1>
    %52 = vector.broadcast %cst_33 : f32 to vector<8x256xf32>
    %53 = arith.select %51, %49, %52 : vector<8x256xi1>, vector<8x256xf32>
    %c0_34 = arith.constant 0 : index
    %c16 = arith.constant 16 : index
    %c0_35 = arith.constant 0 : index
    %54 = vector.load %arg12[%c0_34, %c16, %c0_35] : memref<2x72x256xf32, #tpu.memory_space<vmem>>, vector<1x8x256xf32>
    %55 = vector.shape_cast %54 : vector<1x8x256xf32> to vector<8x256xf32>
    %56 = vector.shape_cast %53 : vector<8x256xf32> to vector<1x8x256xf32>
    tpu.vector_store %arg12[%c0_34, %c16, %c0_35], %56 {strides = array<i32>} : memref<2x72x256xf32, #tpu.memory_space<vmem>>, vector<1x8x256xf32>,
    %c0_36 = arith.constant 0 : index
    %c0_37 = arith.constant 0 : index
    %c127 = arith.constant 127 : index
    %57 = vector.load %arg11[%c0_36, %c0_37, %c127] : memref<2x8x512xf32, #tpu.memory_space<vmem>>, vector<1x8x256xf32>
    %58 = vector.shape_cast %57 : vector<1x8x256xf32> to vector<8x256xf32>
    %cst_38 = arith.constant 0.000000e+00 : f32
    %59 = vector.shape_cast %18 : vector<1x256xi1> to vector<1x256xi1>
    %60 = vector.broadcast %59 : vector<1x256xi1> to vector<8x256xi1>
    %61 = vector.broadcast %cst_38 : f32 to vector<8x256xf32>
    %62 = arith.select %60, %58, %61 : vector<8x256xi1>, vector<8x256xf32>
    %c0_39 = arith.constant 0 : index
    %c24 = arith.constant 24 : index
    %c0_40 = arith.constant 0 : index
    %63 = vector.load %arg12[%c0_39, %c24, %c0_40] : memref<2x72x256xf32, #tpu.memory_space<vmem>>, vector<1x8x256xf32>
    %64 = vector.shape_cast %63 : vector<1x8x256xf32> to vector<8x256xf32>
    %65 = vector.shape_cast %62 : vector<8x256xf32> to vector<1x8x256xf32>
    tpu.vector_store %arg12[%c0_39, %c24, %c0_40], %65 {strides = array<i32>} : memref<2x72x256xf32, #tpu.memory_space<vmem>>, vector<1x8x256xf32>,
    %c0_41 = arith.constant 0 : index
    %c0_42 = arith.constant 0 : index
    %c128_43 = arith.constant 128 : index
    %66 = vector.load %arg11[%c0_41, %c0_42, %c128_43] : memref<2x8x512xf32, #tpu.memory_space<vmem>>, vector<1x8x256xf32>
    %67 = vector.shape_cast %66 : vector<1x8x256xf32> to vector<8x256xf32>
    %c0_44 = arith.constant 0 : index
    %c32 = arith.constant 32 : index
    %c0_45 = arith.constant 0 : index
    %68 = vector.load %arg12[%c0_44, %c32, %c0_45] : memref<2x72x256xf32, #tpu.memory_space<vmem>>, vector<1x8x256xf32>
    %69 = vector.shape_cast %68 : vector<1x8x256xf32> to vector<8x256xf32>
    %70 = vector.shape_cast %67 : vector<8x256xf32> to vector<1x8x256xf32>
    tpu.vector_store %arg12[%c0_44, %c32, %c0_45], %70 {strides = array<i32>} : memref<2x72x256xf32, #tpu.memory_space<vmem>>, vector<1x8x256xf32>,
    %c0_46 = arith.constant 0 : index
    %c0_47 = arith.constant 0 : index
    %c129 = arith.constant 129 : index
    %71 = vector.load %arg11[%c0_46, %c0_47, %c129] : memref<2x8x512xf32, #tpu.memory_space<vmem>>, vector<1x8x256xf32>
    %72 = vector.shape_cast %71 : vector<1x8x256xf32> to vector<8x256xf32>
    %cst_48 = arith.constant 0.000000e+00 : f32
    %73 = vector.shape_cast %20 : vector<1x256xi1> to vector<1x256xi1>
    %74 = vector.broadcast %73 : vector<1x256xi1> to vector<8x256xi1>
    %75 = vector.broadcast %cst_48 : f32 to vector<8x256xf32>
    %76 = arith.select %74, %72, %75 : vector<8x256xi1>, vector<8x256xf32>
    %c0_49 = arith.constant 0 : index
    %c40 = arith.constant 40 : index
    %c0_50 = arith.constant 0 : index
    %77 = vector.load %arg12[%c0_49, %c40, %c0_50] : memref<2x72x256xf32, #tpu.memory_space<vmem>>, vector<1x8x256xf32>
    %78 = vector.shape_cast %77 : vector<1x8x256xf32> to vector<8x256xf32>
    %79 = vector.shape_cast %76 : vector<8x256xf32> to vector<1x8x256xf32>
    tpu.vector_store %arg12[%c0_49, %c40, %c0_50], %79 {strides = array<i32>} : memref<2x72x256xf32, #tpu.memory_space<vmem>>, vector<1x8x256xf32>,
    %c0_51 = arith.constant 0 : index
    %c0_52 = arith.constant 0 : index
    %c143 = arith.constant 143 : index
    %80 = vector.load %arg11[%c0_51, %c0_52, %c143] : memref<2x8x512xf32, #tpu.memory_space<vmem>>, vector<1x8x256xf32>
    %81 = vector.shape_cast %80 : vector<1x8x256xf32> to vector<8x256xf32>
    %cst_53 = arith.constant 0.000000e+00 : f32
    %82 = vector.shape_cast %18 : vector<1x256xi1> to vector<1x256xi1>
    %83 = vector.broadcast %82 : vector<1x256xi1> to vector<8x256xi1>
    %84 = vector.broadcast %cst_53 : f32 to vector<8x256xf32>
    %85 = arith.select %83, %81, %84 : vector<8x256xi1>, vector<8x256xf32>
    %c0_54 = arith.constant 0 : index
    %c48 = arith.constant 48 : index
    %c0_55 = arith.constant 0 : index
    %86 = vector.load %arg12[%c0_54, %c48, %c0_55] : memref<2x72x256xf32, #tpu.memory_space<vmem>>, vector<1x8x256xf32>
    %87 = vector.shape_cast %86 : vector<1x8x256xf32> to vector<8x256xf32>
    %88 = vector.shape_cast %85 : vector<8x256xf32> to vector<1x8x256xf32>
    tpu.vector_store %arg12[%c0_54, %c48, %c0_55], %88 {strides = array<i32>} : memref<2x72x256xf32, #tpu.memory_space<vmem>>, vector<1x8x256xf32>,
    %c0_56 = arith.constant 0 : index
    %c0_57 = arith.constant 0 : index
    %c144 = arith.constant 144 : index
    %89 = vector.load %arg11[%c0_56, %c0_57, %c144] : memref<2x8x512xf32, #tpu.memory_space<vmem>>, vector<1x8x256xf32>
    %90 = vector.shape_cast %89 : vector<1x8x256xf32> to vector<8x256xf32>
    %c0_58 = arith.constant 0 : index
    %c56 = arith.constant 56 : index
    %c0_59 = arith.constant 0 : index
    %91 = vector.load %arg12[%c0_58, %c56, %c0_59] : memref<2x72x256xf32, #tpu.memory_space<vmem>>, vector<1x8x256xf32>
    %92 = vector.shape_cast %91 : vector<1x8x256xf32> to vector<8x256xf32>
    %93 = vector.shape_cast %90 : vector<8x256xf32> to vector<1x8x256xf32>
    tpu.vector_store %arg12[%c0_58, %c56, %c0_59], %93 {strides = array<i32>} : memref<2x72x256xf32, #tpu.memory_space<vmem>>, vector<1x8x256xf32>,
    %c0_60 = arith.constant 0 : index
    %c0_61 = arith.constant 0 : index
    %c145 = arith.constant 145 : index
    %94 = vector.load %arg11[%c0_60, %c0_61, %c145] : memref<2x8x512xf32, #tpu.memory_space<vmem>>, vector<1x8x256xf32>
    %95 = vector.shape_cast %94 : vector<1x8x256xf32> to vector<8x256xf32>
    %cst_62 = arith.constant 0.000000e+00 : f32
    %96 = vector.shape_cast %20 : vector<1x256xi1> to vector<1x256xi1>
    %97 = vector.broadcast %96 : vector<1x256xi1> to vector<8x256xi1>
    %98 = vector.broadcast %cst_62 : f32 to vector<8x256xf32>
    %99 = arith.select %97, %95, %98 : vector<8x256xi1>, vector<8x256xf32>
    %c0_63 = arith.constant 0 : index
    %c64 = arith.constant 64 : index
    %c0_64 = arith.constant 0 : index
    %100 = vector.load %arg12[%c0_63, %c64, %c0_64] : memref<2x72x256xf32, #tpu.memory_space<vmem>>, vector<1x8x256xf32>
    %101 = vector.shape_cast %100 : vector<1x8x256xf32> to vector<8x256xf32>
    %102 = vector.shape_cast %99 : vector<8x256xf32> to vector<1x8x256xf32>
    tpu.vector_store %arg12[%c0_63, %c64, %c0_64], %102 {strides = array<i32>} : memref<2x72x256xf32, #tpu.memory_space<vmem>>, vector<1x8x256xf32>,
    %c0_65 = arith.constant 0 : index
    %c0_66 = arith.constant 0 : index
    %103 = vector.load %arg3[%c0_65, %c0_66] : memref<3x72xf32, #tpu.memory_space<vmem>>, vector<3x72xf32>
    %c0_67 = arith.constant 0 : index
    %c0_68 = arith.constant 0 : index
    %104 = vector.load %arg4[%c0_67, %c0_68] : memref<3x1xf32, #tpu.memory_space<vmem>>, vector<3x1xf32>
    %c0_69 = arith.constant 0 : index
    %c0_70 = arith.constant 0 : index
    %c0_71 = arith.constant 0 : index
    %105 = vector.load %arg12[%c0_69, %c0_70, %c0_71] : memref<2x72x256xf32, #tpu.memory_space<vmem>>, vector<1x72x256xf32>
    %106 = vector.shape_cast %105 : vector<1x72x256xf32> to vector<72x256xf32>
    %cst_72 = arith.constant dense<0.000000e+00> : vector<3x256xf32>
    %107 = tpu.matmul %103, %106, %cst_72 {dimension_numbers = #tpu.dot_dimension_numbers<[1], [0], [0], [1], [0, 0, 1, 1], [], []>} : vector<3x72xf32>, vector<72x256xf32>, vector<3x256xf32> -> vector<3x256xf32>
    %108 = vector.broadcast %104 : vector<3x1xf32> to vector<3x256xf32>
    %109 = arith.addf %107, %108 : vector<3x256xf32>
    %cst_73 = arith.constant 0.000000e+00 : f32
    %110 = vector.broadcast %cst_73 : f32 to vector<3x256xf32>
    %111 = arith.cmpf oge, %109, %110 : vector<3x256xf32>
    %cst_74 = arith.constant 0.00999999977 : f32
    %112 = vector.broadcast %cst_74 : f32 to vector<3x256xf32>
    %113 = arith.mulf %112, %109 : vector<3x256xf32>
    %114 = arith.select %111, %109, %113 : vector<3x256xi1>, vector<3x256xf32>
    %c0_75 = arith.constant 0 : index
    %c0_76 = arith.constant 0 : index
    %c0_77 = arith.constant 0 : index
    %115 = vector.load %arg7[%c0_75, %c0_76, %c0_77] : memref<1x3x256xf32, #tpu.memory_space<vmem>>, vector<1x3x256xf32>
    %116 = vector.shape_cast %115 : vector<1x3x256xf32> to vector<3x256xf32>
    %117 = vector.shape_cast %114 : vector<3x256xf32> to vector<1x3x256xf32>
    tpu.vector_store %arg7[%c0_75, %c0_76, %c0_77], %117 {strides = array<i32>} : memref<1x3x256xf32, #tpu.memory_space<vmem>>, vector<1x3x256xf32>,
    %c0_78 = arith.constant 0 : index
    %c0_79 = arith.constant 0 : index
    %c0_80 = arith.constant 0 : index
    %118 = vector.load %arg2[%c0_78, %c0_79, %c0_80] : memref<1x3x256xf32, #tpu.memory_space<vmem>>, vector<1x3x256xf32>
    %119 = vector.shape_cast %118 : vector<1x3x256xf32> to vector<3x256xf32>
    %c1 = arith.constant 1 : index
    %c0_81 = arith.constant 0 : index
    %c128_82 = arith.constant 128 : index
    %120 = vector.load %arg11[%c1, %c0_81, %c128_82] : memref<2x8x512xf32, #tpu.memory_space<vmem>>, vector<1x3x256xf32>
    %121 = vector.shape_cast %120 : vector<1x3x256xf32> to vector<3x256xf32>
    %122 = vector.shape_cast %119 : vector<3x256xf32> to vector<1x3x256xf32>
    tpu.vector_store %arg11[%c1, %c0_81, %c128_82], %122 {strides = array<i32>} : memref<2x8x512xf32, #tpu.memory_space<vmem>>, vector<1x3x256xf32>,
    %c1_83 = arith.constant 1 : index
    %c0_84 = arith.constant 0 : index
    %c111_85 = arith.constant 111 : index
    %123 = vector.load %arg11[%c1_83, %c0_84, %c111_85] : memref<2x8x512xf32, #tpu.memory_space<vmem>>, vector<1x8x256xf32>
    %124 = vector.shape_cast %123 : vector<1x8x256xf32> to vector<8x256xf32>
    %cst_86 = arith.constant 0.000000e+00 : f32
    %125 = vector.shape_cast %18 : vector<1x256xi1> to vector<1x256xi1>
    %126 = vector.broadcast %125 : vector<1x256xi1> to vector<8x256xi1>
    %127 = vector.broadcast %cst_86 : f32 to vector<8x256xf32>
    %128 = arith.select %126, %124, %127 : vector<8x256xi1>, vector<8x256xf32>
    %c1_87 = arith.constant 1 : index
    %c0_88 = arith.constant 0 : index
    %c0_89 = arith.constant 0 : index
    %129 = vector.load %arg12[%c1_87, %c0_88, %c0_89] : memref<2x72x256xf32, #tpu.memory_space<vmem>>, vector<1x8x256xf32>
    %130 = vector.shape_cast %129 : vector<1x8x256xf32> to vector<8x256xf32>
    %131 = vector.shape_cast %128 : vector<8x256xf32> to vector<1x8x256xf32>
    tpu.vector_store %arg12[%c1_87, %c0_88, %c0_89], %131 {strides = array<i32>} : memref<2x72x256xf32, #tpu.memory_space<vmem>>, vector<1x8x256xf32>,
    %c1_90 = arith.constant 1 : index
    %c0_91 = arith.constant 0 : index
    %c112_92 = arith.constant 112 : index
    %132 = vector.load %arg11[%c1_90, %c0_91, %c112_92] : memref<2x8x512xf32, #tpu.memory_space<vmem>>, vector<1x8x256xf32>
    %133 = vector.shape_cast %132 : vector<1x8x256xf32> to vector<8x256xf32>
    %c1_93 = arith.constant 1 : index
    %c8_94 = arith.constant 8 : index
    %c0_95 = arith.constant 0 : index
    %134 = vector.load %arg12[%c1_93, %c8_94, %c0_95] : memref<2x72x256xf32, #tpu.memory_space<vmem>>, vector<1x8x256xf32>
    %135 = vector.shape_cast %134 : vector<1x8x256xf32> to vector<8x256xf32>
    %136 = vector.shape_cast %133 : vector<8x256xf32> to vector<1x8x256xf32>
    tpu.vector_store %arg12[%c1_93, %c8_94, %c0_95], %136 {strides = array<i32>} : memref<2x72x256xf32, #tpu.memory_space<vmem>>, vector<1x8x256xf32>,
    %c1_96 = arith.constant 1 : index
    %c0_97 = arith.constant 0 : index
    %c113_98 = arith.constant 113 : index
    %137 = vector.load %arg11[%c1_96, %c0_97, %c113_98] : memref<2x8x512xf32, #tpu.memory_space<vmem>>, vector<1x8x256xf32>
    %138 = vector.shape_cast %137 : vector<1x8x256xf32> to vector<8x256xf32>
    %cst_99 = arith.constant 0.000000e+00 : f32
    %139 = vector.shape_cast %20 : vector<1x256xi1> to vector<1x256xi1>
    %140 = vector.broadcast %139 : vector<1x256xi1> to vector<8x256xi1>
    %141 = vector.broadcast %cst_99 : f32 to vector<8x256xf32>
    %142 = arith.select %140, %138, %141 : vector<8x256xi1>, vector<8x256xf32>
    %c1_100 = arith.constant 1 : index
    %c16_101 = arith.constant 16 : index
    %c0_102 = arith.constant 0 : index
    %143 = vector.load %arg12[%c1_100, %c16_101, %c0_102] : memref<2x72x256xf32, #tpu.memory_space<vmem>>, vector<1x8x256xf32>
    %144 = vector.shape_cast %143 : vector<1x8x256xf32> to vector<8x256xf32>
    %145 = vector.shape_cast %142 : vector<8x256xf32> to vector<1x8x256xf32>
    tpu.vector_store %arg12[%c1_100, %c16_101, %c0_102], %145 {strides = array<i32>} : memref<2x72x256xf32, #tpu.memory_space<vmem>>, vector<1x8x256xf32>,
    %c1_103 = arith.constant 1 : index
    %c0_104 = arith.constant 0 : index
    %c127_105 = arith.constant 127 : index
    %146 = vector.load %arg11[%c1_103, %c0_104, %c127_105] : memref<2x8x512xf32, #tpu.memory_space<vmem>>, vector<1x8x256xf32>
    %147 = vector.shape_cast %146 : vector<1x8x256xf32> to vector<8x256xf32>
    %cst_106 = arith.constant 0.000000e+00 : f32
    %148 = vector.shape_cast %18 : vector<1x256xi1> to vector<1x256xi1>
    %149 = vector.broadcast %148 : vector<1x256xi1> to vector<8x256xi1>
    %150 = vector.broadcast %cst_106 : f32 to vector<8x256xf32>
    %151 = arith.select %149, %147, %150 : vector<8x256xi1>, vector<8x256xf32>
    %c1_107 = arith.constant 1 : index
    %c24_108 = arith.constant 24 : index
    %c0_109 = arith.constant 0 : index
    %152 = vector.load %arg12[%c1_107, %c24_108, %c0_109] : memref<2x72x256xf32, #tpu.memory_space<vmem>>, vector<1x8x256xf32>
    %153 = vector.shape_cast %152 : vector<1x8x256xf32> to vector<8x256xf32>
    %154 = vector.shape_cast %151 : vector<8x256xf32> to vector<1x8x256xf32>
    tpu.vector_store %arg12[%c1_107, %c24_108, %c0_109], %154 {strides = array<i32>} : memref<2x72x256xf32, #tpu.memory_space<vmem>>, vector<1x8x256xf32>,
    %c1_110 = arith.constant 1 : index
    %c0_111 = arith.constant 0 : index
    %c128_112 = arith.constant 128 : index
    %155 = vector.load %arg11[%c1_110, %c0_111, %c128_112] : memref<2x8x512xf32, #tpu.memory_space<vmem>>, vector<1x8x256xf32>
    %156 = vector.shape_cast %155 : vector<1x8x256xf32> to vector<8x256xf32>
    %c1_113 = arith.constant 1 : index
    %c32_114 = arith.constant 32 : index
    %c0_115 = arith.constant 0 : index
    %157 = vector.load %arg12[%c1_113, %c32_114, %c0_115] : memref<2x72x256xf32, #tpu.memory_space<vmem>>, vector<1x8x256xf32>
    %158 = vector.shape_cast %157 : vector<1x8x256xf32> to vector<8x256xf32>
    %159 = vector.shape_cast %156 : vector<8x256xf32> to vector<1x8x256xf32>
    tpu.vector_store %arg12[%c1_113, %c32_114, %c0_115], %159 {strides = array<i32>} : memref<2x72x256xf32, #tpu.memory_space<vmem>>, vector<1x8x256xf32>,
    %c1_116 = arith.constant 1 : index
    %c0_117 = arith.constant 0 : index
    %c129_118 = arith.constant 129 : index
    %160 = vector.load %arg11[%c1_116, %c0_117, %c129_118] : memref<2x8x512xf32, #tpu.memory_space<vmem>>, vector<1x8x256xf32>
    %161 = vector.shape_cast %160 : vector<1x8x256xf32> to vector<8x256xf32>
    %cst_119 = arith.constant 0.000000e+00 : f32
    %162 = vector.shape_cast %20 : vector<1x256xi1> to vector<1x256xi1>
    %163 = vector.broadcast %162 : vector<1x256xi1> to vector<8x256xi1>
    %164 = vector.broadcast %cst_119 : f32 to vector<8x256xf32>
    %165 = arith.select %163, %161, %164 : vector<8x256xi1>, vector<8x256xf32>
    %c1_120 = arith.constant 1 : index
    %c40_121 = arith.constant 40 : index
    %c0_122 = arith.constant 0 : index
    %166 = vector.load %arg12[%c1_120, %c40_121, %c0_122] : memref<2x72x256xf32, #tpu.memory_space<vmem>>, vector<1x8x256xf32>
    %167 = vector.shape_cast %166 : vector<1x8x256xf32> to vector<8x256xf32>
    %168 = vector.shape_cast %165 : vector<8x256xf32> to vector<1x8x256xf32>
    tpu.vector_store %arg12[%c1_120, %c40_121, %c0_122], %168 {strides = array<i32>} : memref<2x72x256xf32, #tpu.memory_space<vmem>>, vector<1x8x256xf32>,
    %c1_123 = arith.constant 1 : index
    %c0_124 = arith.constant 0 : index
    %c143_125 = arith.constant 143 : index
    %169 = vector.load %arg11[%c1_123, %c0_124, %c143_125] : memref<2x8x512xf32, #tpu.memory_space<vmem>>, vector<1x8x256xf32>
    %170 = vector.shape_cast %169 : vector<1x8x256xf32> to vector<8x256xf32>
    %cst_126 = arith.constant 0.000000e+00 : f32
    %171 = vector.shape_cast %18 : vector<1x256xi1> to vector<1x256xi1>
    %172 = vector.broadcast %171 : vector<1x256xi1> to vector<8x256xi1>
    %173 = vector.broadcast %cst_126 : f32 to vector<8x256xf32>
    %174 = arith.select %172, %170, %173 : vector<8x256xi1>, vector<8x256xf32>
    %c1_127 = arith.constant 1 : index
    %c48_128 = arith.constant 48 : index
    %c0_129 = arith.constant 0 : index
    %175 = vector.load %arg12[%c1_127, %c48_128, %c0_129] : memref<2x72x256xf32, #tpu.memory_space<vmem>>, vector<1x8x256xf32>
    %176 = vector.shape_cast %175 : vector<1x8x256xf32> to vector<8x256xf32>
    %177 = vector.shape_cast %174 : vector<8x256xf32> to vector<1x8x256xf32>
    tpu.vector_store %arg12[%c1_127, %c48_128, %c0_129], %177 {strides = array<i32>} : memref<2x72x256xf32, #tpu.memory_space<vmem>>, vector<1x8x256xf32>,
    %c1_130 = arith.constant 1 : index
    %c0_131 = arith.constant 0 : index
    %c144_132 = arith.constant 144 : index
    %178 = vector.load %arg11[%c1_130, %c0_131, %c144_132] : memref<2x8x512xf32, #tpu.memory_space<vmem>>, vector<1x8x256xf32>
    %179 = vector.shape_cast %178 : vector<1x8x256xf32> to vector<8x256xf32>
    %c1_133 = arith.constant 1 : index
    %c56_134 = arith.constant 56 : index
    %c0_135 = arith.constant 0 : index
    %180 = vector.load %arg12[%c1_133, %c56_134, %c0_135] : memref<2x72x256xf32, #tpu.memory_space<vmem>>, vector<1x8x256xf32>
    %181 = vector.shape_cast %180 : vector<1x8x256xf32> to vector<8x256xf32>
    %182 = vector.shape_cast %179 : vector<8x256xf32> to vector<1x8x256xf32>
    tpu.vector_store %arg12[%c1_133, %c56_134, %c0_135], %182 {strides = array<i32>} : memref<2x72x256xf32, #tpu.memory_space<vmem>>, vector<1x8x256xf32>,
    %c1_136 = arith.constant 1 : index
    %c0_137 = arith.constant 0 : index
    %c145_138 = arith.constant 145 : index
    %183 = vector.load %arg11[%c1_136, %c0_137, %c145_138] : memref<2x8x512xf32, #tpu.memory_space<vmem>>, vector<1x8x256xf32>
    %184 = vector.shape_cast %183 : vector<1x8x256xf32> to vector<8x256xf32>
    %cst_139 = arith.constant 0.000000e+00 : f32
    %185 = vector.shape_cast %20 : vector<1x256xi1> to vector<1x256xi1>
    %186 = vector.broadcast %185 : vector<1x256xi1> to vector<8x256xi1>
    %187 = vector.broadcast %cst_139 : f32 to vector<8x256xf32>
    %188 = arith.select %186, %184, %187 : vector<8x256xi1>, vector<8x256xf32>
    %c1_140 = arith.constant 1 : index
    %c64_141 = arith.constant 64 : index
    %c0_142 = arith.constant 0 : index
    %189 = vector.load %arg12[%c1_140, %c64_141, %c0_142] : memref<2x72x256xf32, #tpu.memory_space<vmem>>, vector<1x8x256xf32>
    %190 = vector.shape_cast %189 : vector<1x8x256xf32> to vector<8x256xf32>
    %191 = vector.shape_cast %188 : vector<8x256xf32> to vector<1x8x256xf32>
    tpu.vector_store %arg12[%c1_140, %c64_141, %c0_142], %191 {strides = array<i32>} : memref<2x72x256xf32, #tpu.memory_space<vmem>>, vector<1x8x256xf32>,
    %192 = vector.extract_strided_slice %27 {offsets = [0, 0], sizes = [8, 72], strides = [1, 1]} : vector<12x72xf32> to vector<8x72xf32>
    %193 = vector.extract_strided_slice %28 {offsets = [0, 0], sizes = [8, 1], strides = [1, 1]} : vector<12x1xf32> to vector<8x1xf32>
    %c1_143 = arith.constant 1 : index
    %c0_144 = arith.constant 0 : index
    %c0_145 = arith.constant 0 : index
    %194 = vector.load %arg12[%c1_143, %c0_144, %c0_145] : memref<2x72x256xf32, #tpu.memory_space<vmem>>, vector<1x72x256xf32>
    %195 = vector.shape_cast %194 : vector<1x72x256xf32> to vector<72x256xf32>
    %cst_146 = arith.constant dense<0.000000e+00> : vector<8x256xf32>
    %196 = tpu.matmul %192, %195, %cst_146 {dimension_numbers = #tpu.dot_dimension_numbers<[1], [0], [0], [1], [0, 0, 1, 1], [], []>} : vector<8x72xf32>, vector<72x256xf32>, vector<8x256xf32> -> vector<8x256xf32>
    %197 = vector.broadcast %193 : vector<8x1xf32> to vector<8x256xf32>
    %198 = arith.addf %196, %197 : vector<8x256xf32>
    %cst_147 = arith.constant 0.000000e+00 : f32
    %199 = vector.broadcast %cst_147 : f32 to vector<8x256xf32>
    %200 = arith.cmpf oge, %198, %199 : vector<8x256xf32>
    %cst_148 = arith.constant 0.00999999977 : f32
    %201 = vector.broadcast %cst_148 : f32 to vector<8x256xf32>
    %202 = arith.mulf %201, %198 : vector<8x256xf32>
    %203 = arith.select %200, %198, %202 : vector<8x256xi1>, vector<8x256xf32>
    %c0_149 = arith.constant 0 : index
    %c0_150 = arith.constant 0 : index
    %c0_151 = arith.constant 0 : index
    %204 = vector.load %arg9[%c0_149, %c0_150, %c0_151] : memref<1x8x256xf32, #tpu.memory_space<vmem>>, vector<1x8x256xf32>
    %205 = vector.shape_cast %204 : vector<1x8x256xf32> to vector<8x256xf32>
    %206 = vector.shape_cast %203 : vector<8x256xf32> to vector<1x8x256xf32>
    tpu.vector_store %arg9[%c0_149, %c0_150, %c0_151], %206 {strides = array<i32>} : memref<1x8x256xf32, #tpu.memory_space<vmem>>, vector<1x8x256xf32>,
    %c0_152 = arith.constant 0 : index
    %c0_153 = arith.constant 0 : index
    %c128_154 = arith.constant 128 : index
    %207 = vector.load %arg11[%c0_152, %c0_153, %c128_154] : memref<2x8x512xf32, #tpu.memory_space<vmem>>, vector<1x3x256xf32>
    %208 = vector.shape_cast %207 : vector<1x3x256xf32> to vector<3x256xf32>
    %209 = vector.shape_cast %114 : vector<3x256xf32> to vector<1x3x256xf32>
    tpu.vector_store %arg11[%c0_152, %c0_153, %c128_154], %209 {strides = array<i32>} : memref<2x8x512xf32, #tpu.memory_space<vmem>>, vector<1x3x256xf32>,
    %c0_155 = arith.constant 0 : index
    %c0_156 = arith.constant 0 : index
    %c111_157 = arith.constant 111 : index
    %210 = vector.load %arg11[%c0_155, %c0_156, %c111_157] : memref<2x8x512xf32, #tpu.memory_space<vmem>>, vector<1x8x256xf32>
    %211 = vector.shape_cast %210 : vector<1x8x256xf32> to vector<8x256xf32>
    %cst_158 = arith.constant 0.000000e+00 : f32
    %212 = vector.shape_cast %18 : vector<1x256xi1> to vector<1x256xi1>
    %213 = vector.broadcast %212 : vector<1x256xi1> to vector<8x256xi1>
    %214 = vector.broadcast %cst_158 : f32 to vector<8x256xf32>
    %215 = arith.select %213, %211, %214 : vector<8x256xi1>, vector<8x256xf32>
    %c0_159 = arith.constant 0 : index
    %c0_160 = arith.constant 0 : index
    %c0_161 = arith.constant 0 : index
    %216 = vector.load %arg12[%c0_159, %c0_160, %c0_161] : memref<2x72x256xf32, #tpu.memory_space<vmem>>, vector<1x8x256xf32>
    %217 = vector.shape_cast %216 : vector<1x8x256xf32> to vector<8x256xf32>
    %218 = vector.shape_cast %215 : vector<8x256xf32> to vector<1x8x256xf32>
    tpu.vector_store %arg12[%c0_159, %c0_160, %c0_161], %218 {strides = array<i32>} : memref<2x72x256xf32, #tpu.memory_space<vmem>>, vector<1x8x256xf32>,
    %c0_162 = arith.constant 0 : index
    %c0_163 = arith.constant 0 : index
    %c112_164 = arith.constant 112 : index
    %219 = vector.load %arg11[%c0_162, %c0_163, %c112_164] : memref<2x8x512xf32, #tpu.memory_space<vmem>>, vector<1x8x256xf32>
    %220 = vector.shape_cast %219 : vector<1x8x256xf32> to vector<8x256xf32>
    %c0_165 = arith.constant 0 : index
    %c8_166 = arith.constant 8 : index
    %c0_167 = arith.constant 0 : index
    %221 = vector.load %arg12[%c0_165, %c8_166, %c0_167] : memref<2x72x256xf32, #tpu.memory_space<vmem>>, vector<1x8x256xf32>
    %222 = vector.shape_cast %221 : vector<1x8x256xf32> to vector<8x256xf32>
    %223 = vector.shape_cast %220 : vector<8x256xf32> to vector<1x8x256xf32>
    tpu.vector_store %arg12[%c0_165, %c8_166, %c0_167], %223 {strides = array<i32>} : memref<2x72x256xf32, #tpu.memory_space<vmem>>, vector<1x8x256xf32>,
    %c0_168 = arith.constant 0 : index
    %c0_169 = arith.constant 0 : index
    %c113_170 = arith.constant 113 : index
    %224 = vector.load %arg11[%c0_168, %c0_169, %c113_170] : memref<2x8x512xf32, #tpu.memory_space<vmem>>, vector<1x8x256xf32>
    %225 = vector.shape_cast %224 : vector<1x8x256xf32> to vector<8x256xf32>
    %cst_171 = arith.constant 0.000000e+00 : f32
    %226 = vector.shape_cast %20 : vector<1x256xi1> to vector<1x256xi1>
    %227 = vector.broadcast %226 : vector<1x256xi1> to vector<8x256xi1>
    %228 = vector.broadcast %cst_171 : f32 to vector<8x256xf32>
    %229 = arith.select %227, %225, %228 : vector<8x256xi1>, vector<8x256xf32>
    %c0_172 = arith.constant 0 : index
    %c16_173 = arith.constant 16 : index
    %c0_174 = arith.constant 0 : index
    %230 = vector.load %arg12[%c0_172, %c16_173, %c0_174] : memref<2x72x256xf32, #tpu.memory_space<vmem>>, vector<1x8x256xf32>
    %231 = vector.shape_cast %230 : vector<1x8x256xf32> to vector<8x256xf32>
    %232 = vector.shape_cast %229 : vector<8x256xf32> to vector<1x8x256xf32>
    tpu.vector_store %arg12[%c0_172, %c16_173, %c0_174], %232 {strides = array<i32>} : memref<2x72x256xf32, #tpu.memory_space<vmem>>, vector<1x8x256xf32>,
    %c0_175 = arith.constant 0 : index
    %c0_176 = arith.constant 0 : index
    %c127_177 = arith.constant 127 : index
    %233 = vector.load %arg11[%c0_175, %c0_176, %c127_177] : memref<2x8x512xf32, #tpu.memory_space<vmem>>, vector<1x8x256xf32>
    %234 = vector.shape_cast %233 : vector<1x8x256xf32> to vector<8x256xf32>
    %cst_178 = arith.constant 0.000000e+00 : f32
    %235 = vector.shape_cast %18 : vector<1x256xi1> to vector<1x256xi1>
    %236 = vector.broadcast %235 : vector<1x256xi1> to vector<8x256xi1>
    %237 = vector.broadcast %cst_178 : f32 to vector<8x256xf32>
    %238 = arith.select %236, %234, %237 : vector<8x256xi1>, vector<8x256xf32>
    %c0_179 = arith.constant 0 : index
    %c24_180 = arith.constant 24 : index
    %c0_181 = arith.constant 0 : index
    %239 = vector.load %arg12[%c0_179, %c24_180, %c0_181] : memref<2x72x256xf32, #tpu.memory_space<vmem>>, vector<1x8x256xf32>
    %240 = vector.shape_cast %239 : vector<1x8x256xf32> to vector<8x256xf32>
    %241 = vector.shape_cast %238 : vector<8x256xf32> to vector<1x8x256xf32>
    tpu.vector_store %arg12[%c0_179, %c24_180, %c0_181], %241 {strides = array<i32>} : memref<2x72x256xf32, #tpu.memory_space<vmem>>, vector<1x8x256xf32>,
    %c0_182 = arith.constant 0 : index
    %c0_183 = arith.constant 0 : index
    %c128_184 = arith.constant 128 : index
    %242 = vector.load %arg11[%c0_182, %c0_183, %c128_184] : memref<2x8x512xf32, #tpu.memory_space<vmem>>, vector<1x8x256xf32>
    %243 = vector.shape_cast %242 : vector<1x8x256xf32> to vector<8x256xf32>
    %c0_185 = arith.constant 0 : index
    %c32_186 = arith.constant 32 : index
    %c0_187 = arith.constant 0 : index
    %244 = vector.load %arg12[%c0_185, %c32_186, %c0_187] : memref<2x72x256xf32, #tpu.memory_space<vmem>>, vector<1x8x256xf32>
    %245 = vector.shape_cast %244 : vector<1x8x256xf32> to vector<8x256xf32>
    %246 = vector.shape_cast %243 : vector<8x256xf32> to vector<1x8x256xf32>
    tpu.vector_store %arg12[%c0_185, %c32_186, %c0_187], %246 {strides = array<i32>} : memref<2x72x256xf32, #tpu.memory_space<vmem>>, vector<1x8x256xf32>,
    %c0_188 = arith.constant 0 : index
    %c0_189 = arith.constant 0 : index
    %c129_190 = arith.constant 129 : index
    %247 = vector.load %arg11[%c0_188, %c0_189, %c129_190] : memref<2x8x512xf32, #tpu.memory_space<vmem>>, vector<1x8x256xf32>
    %248 = vector.shape_cast %247 : vector<1x8x256xf32> to vector<8x256xf32>
    %cst_191 = arith.constant 0.000000e+00 : f32
    %249 = vector.shape_cast %20 : vector<1x256xi1> to vector<1x256xi1>
    %250 = vector.broadcast %249 : vector<1x256xi1> to vector<8x256xi1>
    %251 = vector.broadcast %cst_191 : f32 to vector<8x256xf32>
    %252 = arith.select %250, %248, %251 : vector<8x256xi1>, vector<8x256xf32>
    %c0_192 = arith.constant 0 : index
    %c40_193 = arith.constant 40 : index
    %c0_194 = arith.constant 0 : index
    %253 = vector.load %arg12[%c0_192, %c40_193, %c0_194] : memref<2x72x256xf32, #tpu.memory_space<vmem>>, vector<1x8x256xf32>
    %254 = vector.shape_cast %253 : vector<1x8x256xf32> to vector<8x256xf32>
    %255 = vector.shape_cast %252 : vector<8x256xf32> to vector<1x8x256xf32>
    tpu.vector_store %arg12[%c0_192, %c40_193, %c0_194], %255 {strides = array<i32>} : memref<2x72x256xf32, #tpu.memory_space<vmem>>, vector<1x8x256xf32>,
    %c0_195 = arith.constant 0 : index
    %c0_196 = arith.constant 0 : index
    %c143_197 = arith.constant 143 : index
    %256 = vector.load %arg11[%c0_195, %c0_196, %c143_197] : memref<2x8x512xf32, #tpu.memory_space<vmem>>, vector<1x8x256xf32>
    %257 = vector.shape_cast %256 : vector<1x8x256xf32> to vector<8x256xf32>
    %cst_198 = arith.constant 0.000000e+00 : f32
    %258 = vector.shape_cast %18 : vector<1x256xi1> to vector<1x256xi1>
    %259 = vector.broadcast %258 : vector<1x256xi1> to vector<8x256xi1>
    %260 = vector.broadcast %cst_198 : f32 to vector<8x256xf32>
    %261 = arith.select %259, %257, %260 : vector<8x256xi1>, vector<8x256xf32>
    %c0_199 = arith.constant 0 : index
    %c48_200 = arith.constant 48 : index
    %c0_201 = arith.constant 0 : index
    %262 = vector.load %arg12[%c0_199, %c48_200, %c0_201] : memref<2x72x256xf32, #tpu.memory_space<vmem>>, vector<1x8x256xf32>
    %263 = vector.shape_cast %262 : vector<1x8x256xf32> to vector<8x256xf32>
    %264 = vector.shape_cast %261 : vector<8x256xf32> to vector<1x8x256xf32>
    tpu.vector_store %arg12[%c0_199, %c48_200, %c0_201], %264 {strides = array<i32>} : memref<2x72x256xf32, #tpu.memory_space<vmem>>, vector<1x8x256xf32>,
    %c0_202 = arith.constant 0 : index
    %c0_203 = arith.constant 0 : index
    %c144_204 = arith.constant 144 : index
    %265 = vector.load %arg11[%c0_202, %c0_203, %c144_204] : memref<2x8x512xf32, #tpu.memory_space<vmem>>, vector<1x8x256xf32>
    %266 = vector.shape_cast %265 : vector<1x8x256xf32> to vector<8x256xf32>
    %c0_205 = arith.constant 0 : index
    %c56_206 = arith.constant 56 : index
    %c0_207 = arith.constant 0 : index
    %267 = vector.load %arg12[%c0_205, %c56_206, %c0_207] : memref<2x72x256xf32, #tpu.memory_space<vmem>>, vector<1x8x256xf32>
    %268 = vector.shape_cast %267 : vector<1x8x256xf32> to vector<8x256xf32>
    %269 = vector.shape_cast %266 : vector<8x256xf32> to vector<1x8x256xf32>
    tpu.vector_store %arg12[%c0_205, %c56_206, %c0_207], %269 {strides = array<i32>} : memref<2x72x256xf32, #tpu.memory_space<vmem>>, vector<1x8x256xf32>,
    %c0_208 = arith.constant 0 : index
    %c0_209 = arith.constant 0 : index
    %c145_210 = arith.constant 145 : index
    %270 = vector.load %arg11[%c0_208, %c0_209, %c145_210] : memref<2x8x512xf32, #tpu.memory_space<vmem>>, vector<1x8x256xf32>
    %271 = vector.shape_cast %270 : vector<1x8x256xf32> to vector<8x256xf32>
    %cst_211 = arith.constant 0.000000e+00 : f32
    %272 = vector.shape_cast %20 : vector<1x256xi1> to vector<1x256xi1>
    %273 = vector.broadcast %272 : vector<1x256xi1> to vector<8x256xi1>
    %274 = vector.broadcast %cst_211 : f32 to vector<8x256xf32>
    %275 = arith.select %273, %271, %274 : vector<8x256xi1>, vector<8x256xf32>
    %c0_212 = arith.constant 0 : index
    %c64_213 = arith.constant 64 : index
    %c0_214 = arith.constant 0 : index
    %276 = vector.load %arg12[%c0_212, %c64_213, %c0_214] : memref<2x72x256xf32, #tpu.memory_space<vmem>>, vector<1x8x256xf32>
    %277 = vector.shape_cast %276 : vector<1x8x256xf32> to vector<8x256xf32>
    %278 = vector.shape_cast %275 : vector<8x256xf32> to vector<1x8x256xf32>
    tpu.vector_store %arg12[%c0_212, %c64_213, %c0_214], %278 {strides = array<i32>} : memref<2x72x256xf32, #tpu.memory_space<vmem>>, vector<1x8x256xf32>,
    %c0_215 = arith.constant 0 : index
    %c0_216 = arith.constant 0 : index
    %c0_217 = arith.constant 0 : index
    %279 = vector.load %arg12[%c0_215, %c0_216, %c0_217] : memref<2x72x256xf32, #tpu.memory_space<vmem>>, vector<1x72x256xf32>
    %280 = vector.shape_cast %279 : vector<1x72x256xf32> to vector<72x256xf32>
    %cst_218 = arith.constant dense<0.000000e+00> : vector<12x256xf32>
    %281 = tpu.matmul %27, %280, %cst_218 {dimension_numbers = #tpu.dot_dimension_numbers<[1], [0], [0], [1], [0, 0, 1, 1], [], []>} : vector<12x72xf32>, vector<72x256xf32>, vector<12x256xf32> -> vector<12x256xf32>
    %282 = vector.broadcast %28 : vector<12x1xf32> to vector<12x256xf32>
    %283 = arith.addf %281, %282 : vector<12x256xf32>
    %cst_219 = arith.constant 0.000000e+00 : f32
    %284 = vector.broadcast %cst_219 : f32 to vector<12x256xf32>
    %285 = arith.cmpf oge, %283, %284 : vector<12x256xf32>
    %cst_220 = arith.constant 0.00999999977 : f32
    %286 = vector.broadcast %cst_220 : f32 to vector<12x256xf32>
    %287 = arith.mulf %286, %283 : vector<12x256xf32>
    %288 = arith.select %285, %283, %287 : vector<12x256xi1>, vector<12x256xf32>
    %289 = vector.extract_strided_slice %288 {offsets = [0, 0], sizes = [8, 256], strides = [1, 1]} : vector<12x256xf32> to vector<8x256xf32>
    %c0_221 = arith.constant 0 : index
    %c0_222 = arith.constant 0 : index
    %c0_223 = arith.constant 0 : index
    %290 = vector.load %arg8[%c0_221, %c0_222, %c0_223] : memref<1x8x256xf32, #tpu.memory_space<vmem>>, vector<1x8x256xf32>
    %291 = vector.shape_cast %290 : vector<1x8x256xf32> to vector<8x256xf32>
    %292 = vector.shape_cast %289 : vector<8x256xf32> to vector<1x8x256xf32>
    tpu.vector_store %arg8[%c0_221, %c0_222, %c0_223], %292 {strides = array<i32>} : memref<1x8x256xf32, #tpu.memory_space<vmem>>, vector<1x8x256xf32>,
    %293 = vector.extract_strided_slice %288 {offsets = [8, 0], sizes = [4, 256], strides = [1, 1]} : vector<12x256xf32> to vector<4x256xf32>
    %c0_224 = arith.constant 0 : index
    %c0_225 = arith.constant 0 : index
    %c0_226 = arith.constant 0 : index
    %294 = vector.load %arg10[%c0_224, %c0_225, %c0_226] : memref<1x4x256xf32, #tpu.memory_space<vmem>>, vector<1x4x256xf32>
    %295 = vector.shape_cast %294 : vector<1x4x256xf32> to vector<4x256xf32>
    %296 = vector.shape_cast %293 : vector<4x256xf32> to vector<1x4x256xf32>
    tpu.vector_store %arg10[%c0_224, %c0_225, %c0_226], %296 {strides = array<i32>} : memref<1x4x256xf32, #tpu.memory_space<vmem>>, vector<1x4x256xf32>,
    return
  }
  func.func @transform_0(%arg0: i32) -> (i32, i32, i32) {
    %c0_i32 = arith.constant 0 : i32
    %c0_i32_0 = arith.constant 0 : i32
    %c0_i32_1 = arith.constant 0 : i32
    return %arg0, %c0_i32, %c0_i32_0 : i32, i32, i32
  }
  func.func @transform_1(%arg0: i32) -> (i32, i32, i32) {
    %c0_i32 = arith.constant 0 : i32
    %c0_i32_0 = arith.constant 0 : i32
    %c0_i32_1 = arith.constant 0 : i32
    return %arg0, %c0_i32, %c0_i32_0 : i32, i32, i32
  }
  func.func @transform_2(%arg0: i32) -> (i32, i32) {
    %c0_i32 = arith.constant 0 : i32
    %c0_i32_0 = arith.constant 0 : i32
    %c0_i32_1 = arith.constant 0 : i32
    return %c0_i32, %c0_i32_0 : i32, i32
  }
  func.func @transform_3(%arg0: i32) -> (i32, i32) {
    %c0_i32 = arith.constant 0 : i32
    %c0_i32_0 = arith.constant 0 : i32
    %c0_i32_1 = arith.constant 0 : i32
    return %c0_i32, %c0_i32_0 : i32, i32
  }
  func.func @transform_4(%arg0: i32) -> (i32, i32) {
    %c0_i32 = arith.constant 0 : i32
    %c0_i32_0 = arith.constant 0 : i32
    %c0_i32_1 = arith.constant 0 : i32
    return %c0_i32, %c0_i32_0 : i32, i32
  }
  func.func @transform_5(%arg0: i32) -> (i32, i32) {
    %c0_i32 = arith.constant 0 : i32
    %c0_i32_0 = arith.constant 0 : i32
    %c0_i32_1 = arith.constant 0 : i32
    return %c0_i32, %c0_i32_0 : i32, i32
  }
  func.func @transform_6(%arg0: i32) -> (i32, i32, i32) {
    %c0_i32 = arith.constant 0 : i32
    %c0_i32_0 = arith.constant 0 : i32
    %c0_i32_1 = arith.constant 0 : i32
    return %arg0, %c0_i32, %c0_i32_0 : i32, i32, i32
  }
  func.func @transform_7(%arg0: i32) -> (i32, i32, i32) {
    %c0_i32 = arith.constant 0 : i32
    %c0_i32_0 = arith.constant 0 : i32
    %c0_i32_1 = arith.constant 0 : i32
    return %arg0, %c0_i32, %c0_i32_0 : i32, i32, i32
  }
  func.func @transform_8(%arg0: i32) -> (i32, i32, i32) {
    %c0_i32 = arith.constant 0 : i32
    %c0_i32_0 = arith.constant 0 : i32
    %c0_i32_1 = arith.constant 0 : i32
    return %arg0, %c0_i32, %c0_i32_0 : i32, i32, i32
  }
  func.func @transform_9(%arg0: i32) -> (i32, i32, i32) {
    %c0_i32 = arith.constant 0 : i32
    %c0_i32_0 = arith.constant 0 : i32
    %c0_i32_1 = arith.constant 0 : i32
    return %arg0, %c0_i32, %c0_i32_0 : i32, i32, i32
  }
}

</mosaic_0001>

<bundles_post_ra>
// kernel: model_ensemble_forward.1
= control target key start
LH: loop header
LB: loop body
LE: loop exit
PB: predicated region body
PF: predicated region fallthrough
CT: control target
= control target key end

     0   :  { %s1818_s30 = smov 0   ;;  %s2180_s0 = inlined_call_operand.vmem [shape: f32[2,3,256], index: 0, kind: input, shape index: {}]   ;;  %s2181_s1 = inlined_call_operand.vmem [shape: f32[2,3,256], index: 1, kind: input, shape index: {}]   ;;  %s2182_s2 = inlined_call_operand.vmem [shape: f32[3,72], index: 2, kind: input, shape index: {}]   ;;  %s2183_s3 = inlined_call_operand.vmem [shape: f32[3,1], index: 3, kind: input, shape index: {}]   ;;  %s2184_s4 = inlined_call_operand.vmem [shape: f32[12,72], index: 4, kind: input, shape index: {}]   ;;  %s2185_s5 = inlined_call_operand.vmem [shape: f32[12,1], index: 5, kind: input, shape index: {}]   ;;  %s2186_s6 = inlined_call_operand.vmem [shape: f32[2,3,256], index: 6, kind: output, shape index: {0}]   ;;  %s2187_s7 = inlined_call_operand.vmem [shape: f32[2,8,256], index: 7, kind: output, shape index: {1}]   ;;  %s2188_s8 = inlined_call_operand.vmem [shape: f32[2,8,256], index: 8, kind: output, shape index: {2}]   ;;  %s2189_s9 = inlined_call_operand.vmem [shape: f32[2,4,256], index: 9, kind: output, shape index: {3}]  }
   0x1 LB: > { %s1449_s10 = sadd.s32 4294967295, %s1755_s30   ;;  %p1453_p0 = scmp.ge.s32.totalorder %s1755_s30, 1  ;;  %s1755_s30 = sphi %s1818_s30, %s20_s30  }
   0x2   : > { %p304_p1 = scmp.lt.s32.totalorder %s1755_s30, 3 }
   0x4   : > { %p305_p2 = pnand %p1453_p0, %p304_p1 }
   0x5   : > { %v1757_v0 = vmov (!%p305_p2), 0.0   ;;  %s1758_s11 = smov (!%p305_p2), 17   ;;  %s1759_s12 = smov (!%p305_p2), 15   ;;  %v616_v7 = vld [vmem:[%s2183_s3] sm:$0x7] (!%p305_p2)  ;;  %v1766_v8 = vmov (!%p305_p2), 0   ;;  %v390_v17 = vlaneseq (!%p305_p2) }
   0x6   : > { %308 = sbr.rel (%p305_p2) target bundleno = 773 (0x305), region = 44  ;;  %449 = vrot.lane.b32.xlu1 (!%p305_p2), %v1757_v0, %s1758_s11  ;;  %425 = vst [vmem:[#allocation2 + $0x8] sm:$0xf8] (!%p305_p2), %v1757_v0  ;;  %426 = vst [vmem:[#allocation2 + $0x10] sm:$0xf8] (!%p305_p2), %v1757_v0  ;;  %493 = vrot.lane.b32.xlu0 (!%p305_p2), %v1757_v0, %s1759_s12  ;;  %p360_p3 = scmp.lt.s32.totalorder (!%p305_p2), %s1449_s10, 1 }
   0x7   : > { %427 = vst [vmem:[#allocation2 + $0x28] sm:$0xf8] (!%p305_p2), %v1757_v0  ;;  %428 = vst [vmem:[#allocation2 + $0x30] sm:$0xf8] (!%p305_p2), %v1757_v0  ;;  %708 = vmatprep.mubr.f32.mxu1 (!%p305_p2), %v1757_v0  ;;  %1251 = vmatprep.mubr.f32.mxu0 (!%p305_p2), %v1757_v0  ;;  %s1760_s13 = smov (!%p305_p2), 16   ;;  %s1761_s18 = smov (!%p305_p2), 1  }
   0x8   : > { %s1762_s19 = smov (!%p305_p2), 127   ;;  %s1763_s20 = smov (!%p305_p2), 112   ;;  %1640 = vset.pattern.permute.xlu1 (!%p305_p2), %v1766_v8  ;;  %1746 = vset.pattern.permute.xlu0 (!%p305_p2), %v1766_v8  ;;  %v391_v18 = vand.u32 (!%p305_p2), 127, %v390_v17  ;;  %vm455_vm1 = vcmask (!%p305_p2), 138240   ;;  %vm476_vm2 = vcmask (!%p305_p2), 130048   ;;  %vm520_vm4 = vcmask (!%p305_p2), 7168  }
   0x9   : > { %s1764_s21 = smov (!%p305_p2), 113   ;;  %s1765_s22 = smov (!%p305_p2), 111   ;;  %vm1767_vm5 = vmmov (!%p305_p2), 1   ;;  %vm499_vm7 = vcmask (!%p305_p2), 121856   ;;  %vm545_vm12 = vcmask (!%p305_p2), 1039360   ;;  %vm2190_vm14 = vcmask (!%p305_p2), 916480  }
   0xa   : > { %470 = vrot.lane.b32.xlu1 (!%p305_p2), %v1757_v0, %s1760_s13  ;;  %v392_v21 = vadd.s32 (!%p305_p2), 128, %v391_v18  ;;  %v397_v25 = vand.u32 (!%p305_p2), 15, %v391_v18  ;;  %v429_v38 = vld [vmem:[%s2184_s4] sm:$0xff] (!%p305_p2) }
   0xc   : > { %v404_v24 = vand.u32 (!%p305_p2), 15, %v392_v21  ;;  %vm1911_vm3 = vcmp.ge.s32.totalorder (!%p305_p2), %v397_v25, 1  ;;  %vm1938_vm10 = vcmp.le.s32.totalorder (!%p305_p2), %v397_v25, 14 }
   0xd   : > { %s2225_s10 = smov (!%p360_p3, %s1449_s10), 1  ;;  %vm1929_vm8 = vmpackc.low %vm1767_vm5, %vm1911_vm3 }
   0xe   : > { %s1841_s14 = sshll.u32 %s2225_s10, 3  ;;  %514 = vrot.lane.b32.xlu1 %v1757_v0, %s1761_s18  ;;  %vm1907_vm0 = vcmp.ge.s32.totalorder %v404_v24, 1  ;;  %vm1933_vm9 = vcmp.le.s32.totalorder %v404_v24, 14  ;;  %vm1961_vm13 = vmpackc.low %vm1911_vm3, %vm1938_vm10  ;;  %v615_v24 = vld [vmem:[%s2182_s2] sm:$0x7]  ;;  %s1475_s23 = sshll.u32 %s2225_s10, 4 }
   0xf   : > { %s364_s17 = scalar_lea.vmem %s2180_s0, %s1841_s14  ;;  %s369_s27 = scalar_lea.vmem %s2181_s1, %s1841_s14  ;;  %vm1920_vm6 = vmpackc.low %vm1767_vm5, %vm1907_vm0 }
  0x10   : > { %v433_v1 = vld [vmem:[%s364_s17] sm:$0x77]  ;;  %vm1953_vm11 = vmpackc.low %vm1907_vm0, %vm1933_vm9  ;;  %vm566_vm0 = vcmask 924672   ;;  %s374_s17 = scalar_lea.vmem %s2186_s6, %s1841_s14  ;;  %s379_s26 = scalar_lea.vmem %s2187_s7, %s1475_s23 }
  0x11   : > { %v435_v2 = vcombine.high %v433_v1, %v433_v1  ;;  %437 = vst [vmem:[#allocation2 + $0x8] sm:$0x7] %v433_v1  ;;  %v726_v9 = vld [vmem:[%s369_s27] sm:$0x77]  ;;  %vm1974_vm15 = vmpackc.low %vm1933_vm9, %vm1767_vm5  ;;  %s384_s28 = scalar_lea.vmem %s2188_s8, %s1475_s23  ;;  %s389_s16 = scalar_lea.vmem %s2189_s9, %s1841_s14 }
  0x12   : > { %731 = vst [vmem:[#allocation2 + $0x28] sm:$0x7] %v726_v9  ;;  %v728_v10 = vcombine.high %v726_v9, %v726_v9  ;;  %vm1983_vm3 = vmpackc.low %vm1938_vm10, %vm1767_vm5  ;;  %vm2192_vm5 = vcmask 908288  }
  0x13   : > { %438 = vst [vmem:[#allocation2 + $0x10] sm:$0x7] %v435_v2 }
  0x14   : > { %732 = vst [vmem:[#allocation2 + $0x30] sm:$0x7] %v728_v10 }
  0x18   : > { %v1849_v3 = vld [vmem:[#allocation2 + $0x8] sm:$0xff] }
  0x19   : > { %v1881_v11 = vld [vmem:[#allocation2 + $0x28] sm:$0xff] }
  0x1a   : > { %v1851_v4 = vld [vmem:[#allocation2 + $0x10] sm:$0xff]  ;;  %v1885_v12 = vpack.i.bf16 %v1881_v11, %v1757_v0 }
  0x1b   : > { %v1605_v5 = vpack.i.bf16 %v1851_v4, %v1849_v3  ;;  %v1625_v6 = vpack.i.bf16 %v1757_v0, %v1851_v4  ;;  %v1891_v13 = vld [vmem:[#allocation2 + $0x30] sm:$0xff] }
  0x1c   : > { %v1666_v14 = vpack.i.bf16 %v1757_v0, %v1891_v13 }
  0x1d   : > { %1606 = vrot.lane.b32.xlu0 %v1605_v5, %s1758_s11  ;;  %1621 = vrot.lane.b32.xlu1 %v1605_v5, %s1761_s18 }
  0x21   : > { %1611 = vrot.lane.b32.xlu0 %v1605_v5, %s1760_s13  ;;  %539 = vrot.lane.b32.xlu1 %v1849_v3, %s1762_s19 }
  0x25   : > { %1616 = vrot.lane.b32.xlu0 %v1605_v5, %s1759_s12  ;;  %1636 = vrot.lane.b32.xlu1 %v1625_v6, %s1763_s20 }
  0x29   : > { %1626 = vrot.lane.b32.xlu0 %v1625_v6, %s1762_s19  ;;  %581 = vrot.lane.b32.xlu1 %v1849_v3, %s1763_s20 }
  0x2d   : > { %1631 = vrot.lane.b32.xlu0 %v1625_v6, %s1764_s21  ;;  %604 = vrot.lane.b32.xlu1 %v1757_v0, %s1765_s22 }
  0x31   : > { %560 = vrot.lane.b32.xlu0 %v1849_v3, %s1764_s21  ;;  %637 = vperm.xlu1 %1640, %v616_v7  }
  0x35   : > { %602 = vrot.lane.b32.xlu0 %v1851_v4, %s1765_s22  ;;  %1647 = vrot.lane.b32.xlu1 %v1885_v12, %s1760_s13 }
  0x39   : > { %600 = vrot.lane.b32.xlu0 %v1849_v3, %s1765_s22  ;;  %1657 = vrot.lane.b32.xlu1 %v1885_v12, %s1761_s18 }
  0x3d   : > { %1642 = vrot.lane.b32.xlu0 %v1885_v12, %s1758_s11  ;;  %1667 = vrot.lane.b32.xlu1 %v1666_v14, %s1760_s13 }
  0x41   : > { %1652 = vrot.lane.b32.xlu0 %v1885_v12, %s1759_s12  ;;  %1677 = vrot.lane.b32.xlu1 %v1666_v14, %s1761_s18 }
  0x45   : > { %1662 = vrot.lane.b32.xlu0 %v1666_v14, %s1758_s11 }
  0x49   : > { %1672 = vrot.lane.b32.xlu0 %v1666_v14, %s1759_s12 }
  0x4d   : > { %1682 = vrot.lane.b32.xlu0 %v1885_v12, %s1762_s19 }
  0x78   : > { %v450_v15 = vpop.permute.xlu1 %449  ;;  %v494_v19 = vpop.permute.xlu0 %493 }
  0x7c   : > { %v471_v16 = vpop.permute.xlu1 %470 }
  0x80   : > { %v515_v20 = vpop.permute.xlu1 %514 }
  0x8f   : > { %v1607_v22 = vpop.permute.xlu0 %1606  ;;  %v1622_v23 = vpop.permute.xlu1 %1621 }
  0x90   : > { %v1609_v26 = vunpack.i.h.bf16 %v1607_v22  ;;  %v1608_v27 = vunpack.i.l.bf16 %v1607_v22  ;;  %v1624_v31 = vunpack.i.h.bf16 %v1622_v23  ;;  %v1623_v35 = vunpack.i.l.bf16 %v1622_v23 }
  0x92   : > { %v457_v36 = vsel %vm455_vm1, %v1608_v27, %v1609_v26  ;;  %v456_v39 = vsel %vm455_vm1, %v450_v15, %v1608_v27  ;;  %v522_v46 = vsel %vm520_vm4, %v1623_v35, %v1624_v31  ;;  %v521_v51 = vsel %vm520_vm4, %v515_v20, %v1623_v35 }
  0x93   : > { %v1612_v28 = vpop.permute.xlu0 %1611  ;;  %v540_v30 = vpop.permute.xlu1 %539 }
  0x94   : > { %v1614_v32 = vunpack.i.h.bf16 %v1612_v28  ;;  %v1613_v33 = vunpack.i.l.bf16 %v1612_v28 }
  0x96   : > { %v478_v37 = vsel %vm476_vm2, %v1613_v33, %v1614_v32  ;;  %v477_v40 = vsel %vm476_vm2, %v471_v16, %v1613_v33 }
  0x97   : > { %v1617_v41 = vpop.permute.xlu0 %1616  ;;  %v1514_v42 = vpack.c.bf16 %v478_v37, %v457_v36  ;;  %v1517_v43 = vpack.c.bf16 %v477_v40, %v456_v39  ;;  %v1637_v50 = vpop.permute.xlu1 %1636 }
  0x98   : > { %v1619_v47 = vunpack.i.h.bf16 %v1617_v41  ;;  %v1618_v48 = vunpack.i.l.bf16 %v1617_v41  ;;  %v1639_v61 = vunpack.i.h.bf16 %v1637_v50  ;;  %v1638_v62 = vunpack.i.l.bf16 %v1637_v50 }
  0x99   : > { %1516 = vmatprep.subr.msk.bf16.mxu1 %vm1920_vm6, %v1514_v42 }
  0x9a   : > { %v500_v52 = vsel %vm499_vm7, %v494_v19, %v1618_v48  ;;  %v501_v53 = vsel %vm499_vm7, %v1618_v48, %v1619_v47  ;;  %1519 = vmatpush1.bf16.msk.msra.mxu1 %vm1929_vm8, %v1517_v43  ;;  %v589_v10 = vsel %vm2190_vm14, %v1638_v62, %v1639_v61 }
  0x9b   : > { %v1520_v55 = vpack.c.bf16 %v522_v46, %v501_v53  ;;  %v1523_v56 = vpack.c.bf16 %v521_v51, %v500_v52  ;;  %v1627_v57 = vpop.permute.xlu0 %1626  ;;  %v582_v9 = vpop.permute.xlu1 %581 }
  0x9c   : > { %v1629_v59 = vunpack.i.h.bf16 %v1627_v57  ;;  %v1628_v60 = vunpack.i.l.bf16 %v1627_v57 }
  0x9d   : > { %1522 = vmatprep.subr.msk.bf16.mxu1 %vm1953_vm11, %v1520_v55 }
  0x9e   : > { %v546_v63 = vsel %vm545_vm12, %v540_v30, %v1628_v60  ;;  %v547_v1 = vsel %vm545_vm12, %v1628_v60, %v1629_v59  ;;  %1525 = vmatpush1.bf16.msk.msra.mxu1 %vm1961_vm13, %v1523_v56 }
  0x9f   : > { %v1526_v5 = vpack.c.bf16 %v547_v1, %v1851_v4  ;;  %v1529_v6 = vpack.c.bf16 %v546_v63, %v1849_v3  ;;  %v1632_v7 = vpop.permute.xlu0 %1631  ;;  %v588_v3 = vsel %vm2190_vm14, %v582_v9, %v1638_v62  ;;  %v605_v20 = vpop.permute.xlu1 %604  ;;  %vm2191_vm14 = vcmask 588800  }
  0xa0   : > { %v1634_v14 = vunpack.i.h.bf16 %v1632_v7  ;;  %v1633_v15 = vunpack.i.l.bf16 %v1632_v7 }
  0xa1   : > { %1528 = vmatprep.subr.msk.bf16.mxu1 %vm1974_vm15, %v1526_v5 }
  0xa2   : > { %v568_v4 = vsel %vm566_vm0, %v1633_v15, %v1634_v14  ;;  %1531 = vmatpush1.bf16.msk.msra.mxu1 %vm1983_vm3, %v1529_v6 }
  0xa3   : > { %v1532_v16 = vpack.c.bf16 %v589_v10, %v568_v4  ;;  %v561_v17 = vpop.permute.xlu0 %560 }
  0xa4   : > { %v567_v18 = vsel %vm566_vm0, %v561_v17, %v1633_v15 }
  0xa5   : > { %v1535_v19 = vpack.c.bf16 %v588_v3, %v567_v18  ;;  %1534 = vmatprep.subr.msk.bf16.mxu1 %vm1920_vm6, %v1532_v16 }
  0xa7   : > { %v603_v21 = vpop.permute.xlu0 %602  ;;  %1537 = vmatpush1.bf16.msk.msra.mxu1 %vm1929_vm8, %v1535_v19 }
  0xa8   : > { %v608_v22 = vsel %vm2192_vm5, %v603_v21, %v605_v20 }
  0xa9   : > { %1488 = vmatprep.subr.msk.mxu1 %vm1933_vm9, %v608_v22 }
  0xab   : > { %v601_v23 = vpop.permute.xlu0 %600 }
  0xac   : > { %v607_v25 = vsel %vm2192_vm5, %v601_v23, %v603_v21  ;;  %v431_v21 = vld [vmem:[%s2185_s5] sm:$0xff] }
  0xad   : > { %1489 = vmatpush1.msk.msra.mxu1 %vm1938_vm10, %v607_v25 }
  0xae   : > { %1466 = vmatmul.mubr.msk.f32.vlgmr.msra.gmra.mrb[0].mxu1 %vm2191_vm14, %v615_v24 }
  0xaf   : > { %984 = vmatprep.mubr.f32.mxu1 %v1757_v0  ;;  %v2012_v28 = vpop.permute.xlu0 %1642 }
  0xb0   : > { %v638_v26 = vpop.permute.xlu1 %637  ;;  %v1645_v32 = vunpack.i.h.bf16 %v2012_v28 }
  0xb3   : > { %v2016_v30 = vpop.permute.xlu0 %1652 }
  0xb4   : > { %v2010_v27 = vpop.permute.xlu1 %1647  ;;  %v1655_v41 = vunpack.i.h.bf16 %v2016_v30 }
  0xb5   : > { %v1650_v31 = vunpack.i.h.bf16 %v2010_v27 }
  0xb7   : > { %v1663_v34 = vpop.permute.xlu0 %1662 }
  0xb8   : > { %v2014_v29 = vpop.permute.xlu1 %1657  ;;  %v1665_v37 = vunpack.i.h.bf16 %v1663_v34  ;;  %v1664_v39 = vunpack.i.l.bf16 %v1663_v34 }
  0xb9   : > { %v1660_v40 = vunpack.i.h.bf16 %v2014_v29 }
  0xba   : > { %v745_v46 = vsel %vm455_vm1, %v1665_v37, %v1645_v32  ;;  %v746_v47 = vsel %vm455_vm1, %v1645_v32, %v1664_v39 }
  0xbb   : > { %v1673_v52 = vpop.permute.xlu0 %1672 }
  0xbc   : > { %v1668_v33 = vpop.permute.xlu1 %1667  ;;  %v1675_v56 = vunpack.i.h.bf16 %v1673_v52  ;;  %v1674_v57 = vunpack.i.l.bf16 %v1673_v52 }
  0xbd   : > { %v1670_v35 = vunpack.i.h.bf16 %v1668_v33  ;;  %v1669_v36 = vunpack.i.l.bf16 %v1668_v33 }
  0xbe   : > { %v784_v61 = vsel %vm499_vm7, %v1675_v56, %v1655_v41  ;;  %v785_v62 = vsel %vm499_vm7, %v1655_v41, %v1674_v57  ;;  %v1654_v56 = vunpack.i.l.bf16 %v2016_v30 }
  0xbf   : > { %v766_v42 = vsel %vm476_vm2, %v1670_v35, %v1650_v31  ;;  %v767_v43 = vsel %vm476_vm2, %v1650_v31, %v1669_v36  ;;  %v1683_v22 = vpop.permute.xlu0 %1682 }
  0xc0   : > { %v1538_v48 = vpack.c.bf16 %v767_v43, %v746_v47  ;;  %v1541_v50 = vpack.c.bf16 %v766_v42, %v745_v46  ;;  %v1678_v51 = vpop.permute.xlu1 %1677  ;;  %v1685_v23 = vunpack.i.h.bf16 %v1683_v22  ;;  %v1684_v24 = vunpack.i.l.bf16 %v1683_v22 }
  0xc1   : > { %v1680_v53 = vunpack.i.h.bf16 %v1678_v51  ;;  %v1679_v55 = vunpack.i.l.bf16 %v1678_v51  ;;  %v1649_v43 = vunpack.i.l.bf16 %v2010_v27  ;;  %v1644_v46 = vunpack.i.l.bf16 %v2012_v28 }
  0xc2   : > { %1540 = vmatprep.subr.msk.bf16.mxu1 %vm1920_vm6, %v1538_v48 }
  0xc3   : > { %v804_v59 = vsel %vm520_vm4, %v1680_v53, %v1660_v40  ;;  %v805_v60 = vsel %vm520_vm4, %v1660_v40, %v1679_v55  ;;  %1543 = vmatpush1.bf16.msk.msra.mxu1 %vm1929_vm8, %v1541_v50  ;;  %v1659_v55 = vunpack.i.l.bf16 %v2014_v29 }
  0xc4   : > { %v1544_v63 = vpack.c.bf16 %v805_v60, %v785_v62  ;;  %v1547_v1 = vpack.c.bf16 %v804_v59, %v784_v61 }
  0xc6   : > { %1546 = vmatprep.subr.msk.bf16.mxu1 %vm1953_vm11, %v1544_v63 }
  0xc7   : > { %1549 = vmatpush1.bf16.msk.msra.mxu1 %vm1961_vm13, %v1547_v1 }
 0x181   : > { %v710_v5 = vpop.f32.mrb[0].mxu1 }
 0x182   : > { %v711_v6 = vadd.f32 %v710_v5, %v638_v26  ;;  %v712_v7 = vpop.f32.mrb[1].mxu1 }
 0x183   : > { %v713_v9 = vadd.f32 %v712_v7, %v638_v26 }
 0x184   : > { %vm715_vm14 = vcmp.ge.f32.partialorder %v711_v6, 0.0  ;;  %v717_v10 = vmul.f32 0.01, %v711_v6 }
 0x185   : > { %vm716_vm5 = vcmp.ge.f32.partialorder %v713_v9, 0.0  ;;  %v718_v14 = vmul.f32 0.01, %v713_v9 }
 0x186   : > { %v719_v15 = vsel %vm715_vm14, %v711_v6, %v717_v10 }
 0x187   : > { %999 = vst [vmem:[#allocation2 + $0x8] sm:$0x7] %v719_v15  ;;  %v720_v4 = vsel %vm716_vm5, %v713_v9, %v718_v14 }
 0x188   : > { %v723_v3 = vcombine.low %v719_v15, %v720_v4  ;;  %1000 = vst [vmem:[#allocation2 + $0x10] sm:$0x7] %v720_v4 }
 0x18a   : > { %725 = vst [vmem:[%s374_s17] sm:$0x77] %v723_v3 }
 0x18e   : > { %v2042_v16 = vld [vmem:[#allocation2 + $0x8] sm:$0xff] }
 0x18f   : > { %v1691_v17 = vpack.i.bf16 %v1891_v13, %v2042_v16  ;;  %v2046_v18 = vld [vmem:[#allocation2 + $0x10] sm:$0xff] }
 0x190   : > { %v1701_v19 = vpack.i.bf16 %v2046_v18, %v2042_v16  ;;  %v1726_v20 = vpack.i.bf16 %v1757_v0, %v2046_v18 }
 0x191   : > { %1692 = vrot.lane.b32.xlu0 %v1691_v17, %s1764_s21  ;;  %1687 = vrot.lane.b32.xlu1 %v1691_v17, %s1762_s19 }
 0x195   : > { %1697 = vrot.lane.b32.xlu1 %v1691_v17, %s1763_s20  ;;  %1702 = vrot.lane.b32.xlu0 %v1701_v19, %s1758_s11 }
 0x199   : > { %1707 = vrot.lane.b32.xlu1 %v1701_v19, %s1760_s13  ;;  %1712 = vrot.lane.b32.xlu0 %v1701_v19, %s1759_s12 }
 0x19d   : > { %1717 = vrot.lane.b32.xlu1 %v1701_v19, %s1761_s18  ;;  %1727 = vrot.lane.b32.xlu0 %v1726_v20, %s1762_s19 }
 0x1a1   : > { %1722 = vrot.lane.b32.xlu1 %v1885_v12, %s1764_s21  ;;  %1732 = vrot.lane.b32.xlu0 %v1726_v20, %s1764_s21 }
 0x1a5   : > { %1742 = vrot.lane.b32.xlu1 %v1726_v20, %s1763_s20  ;;  %1737 = vrot.lane.b32.xlu0 %v1885_v12, %s1763_s20  ;;  %v432_v12 = vld [vmem:[%s2185_s5 + $0x8] sm:$0xf] }
 0x1a9   : > { %1149 = vrot.lane.b32.xlu1 %v2046_v18, %s1765_s22  ;;  %1151 = vrot.lane.b32.xlu0 %v1757_v0, %s1765_s22 }
 0x1ad   : > { %1147 = vrot.lane.b32.xlu1 %v2042_v16, %s1765_s22  ;;  %882 = vrot.lane.b32.xlu0 %v1891_v13, %s1765_s22 }
 0x1b1   : > { %884 = vrot.lane.b32.xlu1 %v1757_v0, %s1765_s22  ;;  %880 = vrot.lane.b32.xlu0 %v1881_v11, %s1765_s22 }
 0x1b5   : > { %1181 = vperm.xlu1 %1640, %v432_v12   ;;  %914 = vperm.xlu0 %1746, %v431_v21  }
 0x203   : > { %v2084_v25 = vpop.permute.xlu0 %1692  ;;  %v1688_v26 = vpop.permute.xlu1 %1687 }
 0x204   : > { %v1690_v31 = vunpack.i.h.bf16 %v1688_v26  ;;  %v1689_v1 = vunpack.i.l.bf16 %v1688_v26  ;;  %v1695_v21 = vunpack.i.h.bf16 %v2084_v25  ;;  %v1694_v22 = vunpack.i.l.bf16 %v2084_v25 }
 0x206   : > { %v828_v32 = vsel %vm545_vm12, %v1685_v23, %v1690_v31  ;;  %v829_v33 = vsel %vm545_vm12, %v1690_v31, %v1684_v24 }
 0x207   : > { %v1550_v34 = vpack.c.bf16 %v829_v33, %v1891_v13  ;;  %v1553_v35 = vpack.c.bf16 %v828_v32, %v1881_v11  ;;  %v2090_v36 = vpop.permute.xlu1 %1697  ;;  %v1703_v37 = vpop.permute.xlu0 %1702 }
 0x208   : > { %v1705_v39 = vunpack.i.h.bf16 %v1703_v37  ;;  %v1704_v40 = vunpack.i.l.bf16 %v1703_v37  ;;  %v1700_v23 = vunpack.i.h.bf16 %v2090_v36  ;;  %v1699_v24 = vunpack.i.l.bf16 %v2090_v36 }
 0x209   : > { %1552 = vmatprep.subr.msk.bf16.mxu1 %vm1974_vm15, %v1550_v34 }
 0x20a   : > { %1555 = vmatpush1.bf16.msk.msra.mxu1 %vm1983_vm3, %v1553_v35  ;;  %v1014_v48 = vsel %vm455_vm1, %v1704_v40, %v1705_v39  ;;  %v1013_v52 = vsel %vm455_vm1, %v1644_v46, %v1704_v40  ;;  %vm2213_vm1 = vcmask 916480  }
 0x20b   : > { %v1708_v41 = vpop.permute.xlu1 %1707  ;;  %v1713_v42 = vpop.permute.xlu0 %1712 }
 0x20c   : > { %v1710_v13 = vunpack.i.h.bf16 %v1708_v41  ;;  %v1709_v47 = vunpack.i.l.bf16 %v1708_v41  ;;  %v1714_v11 = vunpack.i.l.bf16 %v1713_v42  ;;  %v1715_v50 = vunpack.i.h.bf16 %v1713_v42 }
 0x20e   : > { %v1034_v51 = vsel %vm476_vm2, %v1709_v47, %v1710_v13  ;;  %v1033_v53 = vsel %vm476_vm2, %v1649_v43, %v1709_v47  ;;  %v1051_v5 = vsel %vm499_vm7, %v1654_v56, %v1714_v11  ;;  %v1052_v6 = vsel %vm499_vm7, %v1714_v11, %v1715_v50  ;;  %vm2214_vm2 = vmmov %vm2213_vm1 }
 0x20f   : > { %v1718_v57 = vpop.permute.xlu1 %1717  ;;  %v1728_v27 = vpop.permute.xlu0 %1727  ;;  %v1562_v59 = vpack.c.bf16 %v1034_v51, %v1014_v48  ;;  %v1565_v28 = vpack.c.bf16 %v1033_v53, %v1013_v52  ;;  %vm2216_vm7 = vmmov %vm2213_vm1  ;;  %v430_v53 = vld [vmem:[%s2184_s4 + $0x8] sm:$0xf] }
 0x210   : > { %v1720_v60 = vunpack.i.h.bf16 %v1718_v57  ;;  %v1719_v61 = vunpack.i.l.bf16 %v1718_v57  ;;  %v1730_v62 = vunpack.i.h.bf16 %v1728_v27  ;;  %v1729_v63 = vunpack.i.l.bf16 %v1728_v27 }
 0x211   : > { %1564 = vmatprep.subr.msk.bf16.mxu0 %vm1920_vm6, %v1562_v59 }
 0x212   : > { %v1071_v29 = vsel %vm520_vm4, %v1659_v55, %v1719_v61  ;;  %v1072_v30 = vsel %vm520_vm4, %v1719_v61, %v1720_v60  ;;  %v1096_v7 = vsel %vm545_vm12, %v1729_v63, %v1730_v62  ;;  %1567 = vmatpush1.bf16.msk.msra.mxu0 %vm1929_vm8, %v1565_v28  ;;  %v1095_v4 = vsel %vm545_vm12, %v1689_v1, %v1729_v63  ;;  %vm2215_vm4 = vmmov %vm2213_vm1 }
 0x213   : > { %v1568_v9 = vpack.c.bf16 %v1072_v30, %v1052_v6  ;;  %v1571_v10 = vpack.c.bf16 %v1071_v29, %v1051_v5  ;;  %v1723_v14 = vpop.permute.xlu1 %1722  ;;  %v1733_v15 = vpop.permute.xlu0 %1732  ;;  %v1574_v3 = vpack.c.bf16 %v1096_v7, %v2046_v18  ;;  %v1577_v18 = vpack.c.bf16 %v1095_v4, %v2042_v16 }
 0x214   : > { %v1725_v17 = vunpack.i.h.bf16 %v1723_v14  ;;  %v1724_v19 = vunpack.i.l.bf16 %v1723_v14  ;;  %v1735_v20 = vunpack.i.h.bf16 %v1733_v15  ;;  %v1734_v12 = vunpack.i.l.bf16 %v1733_v15 }
 0x215   : > { %1570 = vmatprep.subr.msk.bf16.mxu0 %vm1953_vm11, %v1568_v9  ;;  %vm2217_vm11 = vcmask 908288  }
 0x216   : > { %1573 = vmatpush1.bf16.msk.msra.mxu0 %vm1961_vm13, %v1571_v10  ;;  %v848_v58 = vsel %vm566_vm0, %v1725_v17, %v1695_v21  ;;  %v849_v35 = vsel %vm566_vm0, %v1695_v21, %v1724_v19  ;;  %v1115_v25 = vsel %vm566_vm0, %v1694_v22, %v1734_v12  ;;  %v1116_v37 = vsel %vm566_vm0, %v1734_v12, %v1735_v20  ;;  %vm2218_vm12 = vmmov %vm2217_vm11 }
 0x217   : > { %v1743_v26 = vpop.permute.xlu1 %1742  ;;  %v1738_v31 = vpop.permute.xlu0 %1737  ;;  %1576 = vmatprep.subr.msk.bf16.mxu0 %vm1974_vm15, %v1574_v3 }
 0x218   : > { %v1745_v54 = vunpack.i.h.bf16 %v1743_v26  ;;  %v1744_v32 = vunpack.i.l.bf16 %v1743_v26  ;;  %v1740_v33 = vunpack.i.h.bf16 %v1738_v31  ;;  %v1739_v34 = vunpack.i.l.bf16 %v1738_v31 }
 0x21a   : > { %v1135_v36 = vsel %vm2213_vm1, %v1699_v24, %v1744_v32  ;;  %v1136_v16 = vsel %vm2214_vm2, %v1744_v32, %v1745_v54  ;;  %v868_v39 = vsel %vm2215_vm4, %v1740_v33, %v1700_v23  ;;  %v869_v2 = vsel %vm2216_vm7, %v1700_v23, %v1739_v34  ;;  %1579 = vmatpush1.bf16.msk.msra.mxu0 %vm1983_vm3, %v1577_v18 }
 0x21b   : > { %v1580_v40 = vpack.c.bf16 %v1136_v16, %v1116_v37  ;;  %v1583_v41 = vpack.c.bf16 %v1135_v36, %v1115_v25  ;;  %v1559_v42 = vpack.c.bf16 %v868_v39, %v848_v58  ;;  %v1556_v43 = vpack.c.bf16 %v869_v2, %v849_v35  ;;  %v1150_v46 = vpop.permute.xlu1 %1149  ;;  %v1152_v13 = vpop.permute.xlu0 %1151 }
 0x21c   : > { %v1154_v47 = vsel %vm2217_vm11, %v1150_v46, %v1152_v13 }
 0x21d   : > { %1558 = vmatprep.subr.msk.bf16.mxu1 %vm1920_vm6, %v1556_v43  ;;  %1582 = vmatprep.subr.msk.bf16.mxu0 %vm1920_vm6, %v1580_v40  ;;  %vm2219_vm6 = vcmask 588800  }
 0x21e   : > { %1561 = vmatpush1.bf16.msk.msra.mxu1 %vm1929_vm8, %v1559_v42  ;;  %1585 = vmatpush1.bf16.msk.msra.mxu0 %vm1929_vm8, %v1583_v41  ;;  %vm2220_vm8 = vmmov %vm2217_vm11 }
 0x21f   : > { %v1148_v8 = vpop.permute.xlu1 %1147  ;;  %v883_v11 = vpop.permute.xlu0 %882  ;;  %1512 = vmatprep.subr.msk.mxu0 %vm1933_vm9, %v1154_v47  ;;  %vm2221_vm13 = vmmov %vm2220_vm8 }
 0x220   : > { %v1153_v48 = vsel %vm2218_vm12, %v1148_v8, %v1150_v46  ;;  %vm2222_vm14 = vmmov %vm2219_vm6 }
 0x221   : > { %vm2223_vm15 = vmmov %vm2219_vm6 }
 0x222   : > { %1513 = vmatpush1.msk.msra.mxu0 %vm1938_vm10, %v1153_v48 }
 0x223   : > { %v885_v50 = vpop.permute.xlu1 %884  ;;  %v881_v51 = vpop.permute.xlu0 %880  ;;  %1468 = vmatmul.mubr.msk.f32.vlgmr.msra.gmra.mrb[0].mxu0 %vm2219_vm6, %v429_v38 }
 0x224   : > { %v887_v44 = vsel %vm2220_vm8, %v883_v11, %v885_v50  ;;  %v886_v52 = vsel %vm2221_vm13, %v881_v51, %v883_v11  ;;  %1257 = vmatprep.mubr.f32.mxu0 %v1757_v0 }
 0x225   : > { %1500 = vmatprep.subr.msk.mxu1 %vm1933_vm9, %v887_v44 }
 0x226   : > { %1501 = vmatpush1.msk.msra.mxu1 %vm1938_vm10, %v886_v52 }
 0x227   : > { %1467 = vmatmul.mubr.msk.f32.vlgmr.msra.gmra.mrb[2].mxu1 %vm2222_vm14, %v429_v38  ;;  %1469 = vmatmul.mubr.msk.f32.gmra.mrb[2].mxu0 %vm2223_vm15, %v430_v53 }
 0x234   : > { %v915_v55 = vpop.permute.xlu0 %914  ;;  %v1182_v59 = vpop.permute.xlu1 %1181 }
 0x2f6   : > { %v1253_v56 = vpop.f32.mrb[0].mxu0 }
 0x2f7   : > { %v1254_v57 = vadd.f32 %v1253_v56, %v915_v55  ;;  %v1255_v27 = vpop.f32.mrb[1].mxu0 }
 0x2f8   : > { %v1256_v0 = vadd.f32 %v1255_v27, %v915_v55 }
 0x2f9   : > { %vm1264_vm0 = vcmp.ge.f32.partialorder %v1254_v57, 0.0  ;;  %v1268_v45 = vmul.f32 0.01, %v1254_v57 }
 0x2fa   : > { %vm1265_vm9 = vcmp.ge.f32.partialorder %v1256_v0, 0.0  ;;  %v1269_v49 = vmul.f32 0.01, %v1256_v0  ;;  %v986_v28 = vpop.f32.mrb[2].mxu1  ;;  %v1259_v60 = vpop.f32.mrb[2].mxu0 }
 0x2fb   : > { %v1272_v61 = vsel %vm1264_vm0, %v1254_v57, %v1268_v45  ;;  %v987_v62 = vadd.f32 %v986_v28, %v915_v55  ;;  %v1260_v63 = vadd.f32 %v1259_v60, %v1182_v59  ;;  %v988_v1 = vpop.f32.mrb[3].mxu1  ;;  %v1261_v5 = vpop.f32.mrb[3].mxu0 }
 0x2fc   : > { %1276 = vst [vmem:[%s379_s26] sm:$0xff] %v1272_v61  ;;  %v1273_v6 = vsel %vm1265_vm9, %v1256_v0, %v1269_v49  ;;  %v989_v29 = vadd.f32 %v988_v1, %v915_v55  ;;  %v1262_v30 = vadd.f32 %v1261_v5, %v1182_v59 }
 0x2fd   : > { %1277 = vst [vmem:[%s379_s26 + $0x8] sm:$0xff] %v1273_v6  ;;  %vm991_vm10 = vcmp.ge.f32.partialorder %v987_v62, 0.0  ;;  %v993_v7 = vmul.f32 0.01, %v987_v62  ;;  %vm1266_vm3 = vcmp.ge.f32.partialorder %v1260_v63, 0.0 }
 0x2fe   : > { %v1270_v9 = vmul.f32 0.01, %v1260_v63  ;;  %vm992_vm5 = vcmp.ge.f32.partialorder %v989_v29, 0.0  ;;  %v994_v10 = vmul.f32 0.01, %v989_v29  ;;  %vm1267_vm1 = vcmp.ge.f32.partialorder %v1262_v30, 0.0 }
 0x2ff   : > { %v1271_v14 = vmul.f32 0.01, %v1262_v30  ;;  %v995_v15 = vsel %vm991_vm10, %v987_v62, %v993_v7 }
 0x300   : > { %v1274_v4 = vsel %vm1266_vm3, %v1260_v63, %v1270_v9  ;;  %997 = vst [vmem:[%s384_s28] sm:$0xff] %v995_v15  ;;  %v996_v3 = vsel %vm992_vm5, %v989_v29, %v994_v10 }
 0x301   : > { %v1275_v17 = vsel %vm1267_vm1, %v1262_v30, %v1271_v14  ;;  %998 = vst [vmem:[%s384_s28 + $0x8] sm:$0xff] %v996_v3 }
 0x302   : > { %v1280_v19 = vcombine.low %v1274_v4, %v1275_v17 }
 0x304   : > { %1282 = vst [vmem:[%s389_s16] sm:$0xff] %v1280_v19 }
 0x305 PF: > { %s20_s30 = sadd.s32 1, %s1755_s30  }
 0x306   : > { %p17_p4 = scmp.ge.s32.totalorder %s20_s30, 4  }
 0x308   :  { %19 = sbr.rel (!%p17_p4) target bundleno = 1 (0x1), region = 115 }

</bundles_post_ra>
